<compile_context>
chip_gen: v5e
topology: v5e:2x2
jax: 0.10.0
libtpu: 0.0.40
codegen_flags: <defaults>
</compile_context>

<pallas_src>
import jax
import jax.numpy as jnp
from jax.experimental import pallas as pl
from jax.experimental.pallas import tpu as pltpu

EPS = 1e-5  # PyTorch BatchNorm1d default


def _pick_tile_n(n, preferred):
    if n <= preferred:
        return n                      # single full-extent tile (always legal)
    return max(8, (preferred // 8) * 8)  # sublane-aligned tile, cdiv grid + mask


def _vmem_limit(est_bytes):
    """Generation-aware VMEM limit: ~3/4 of physical capacity, >= estimate."""
    try:
        cap = pltpu.get_tpu_info().vmem_capacity_bytes
    except Exception:
        cap = 64 << 20                 # conservative (v7x per-TC) fallback
    ceiling = max(int(cap) * 3 // 4, 16 << 20)
    want = est_bytes * 5 // 4 + (2 << 20)
    return int(min(max(want, 16 << 20), ceiling))


def byol_prediction_mlp(x, w1_t, b1, gamma, beta, w2_t, b2, *,
                        tile_n=512, compute_dtype=jnp.bfloat16, out_dtype=None):
    """Forward pass of prediction_MLP_BYOL_0 (training-mode BatchNorm1d).

    x: [N, in_dim] f32.  w1_t: [in_dim, hidden] (pre-transposed), w2_t: [hidden, out].
    b1/gamma/beta: [1, hidden], b2: [1, out].
    """
    N, in_dim = x.shape
    hidden = w1_t.shape[1]
    out_dim = w2_t.shape[1]
    out_dtype = x.dtype if out_dtype is None else out_dtype

    tn = _pick_tile_n(N, tile_n)
    n_tiles = pl.cdiv(N, tn)
    cbytes = jnp.dtype(compute_dtype).itemsize
    obytes = jnp.dtype(out_dtype).itemsize

    w1c = w1_t.astype(compute_dtype)
    w2c = w2_t.astype(compute_dtype)
    b1f = b1.astype(jnp.float32).reshape(1, hidden)
    gmf = gamma.astype(jnp.float32).reshape(1, hidden)
    btf = beta.astype(jnp.float32).reshape(1, hidden)
    b2f = b2.astype(jnp.float32).reshape(1, out_dim)

    def kernel(x_ref, w1_ref, b1_ref, g_ref, bta_ref, w2_ref, b2_ref, o_ref,
               h_scr, sum_ref, sumsq_ref, scale_ref, shift_ref):
        phase = pl.program_id(0)
        i = pl.program_id(1)

        @pl.when(phase == 0)
        def _phase0():
            @pl.when(i == 0)
            def _init_stats():
                sum_ref[...] = jnp.zeros_like(sum_ref)
                sumsq_ref[...] = jnp.zeros_like(sumsq_ref)

            xb = x_ref[...].astype(compute_dtype)      # in-kernel cast of x
            h = jnp.dot(xb, w1_ref[...], preferred_element_type=jnp.float32)
            h = h + b1_ref[...]
            # Mask rows of the padded last tile so stats stay exact.
            row = jax.lax.broadcasted_iota(jnp.int32, (tn, 1), 0) + i * tn
            h = jnp.where(row < N, h, 0.0)
            h_scr[i] = h.astype(h_scr.dtype)           # persistent VMEM stash
            sum_ref[...] += jnp.sum(h, axis=0, keepdims=True)
            sumsq_ref[...] += jnp.sum(h * h, axis=0, keepdims=True)

        @pl.when(phase == 1)
        def _phase1():
            @pl.when(i == 0)
            def _fold_bn():
                inv_n = jnp.float32(1.0 / N)
                mean = sum_ref[...] * inv_n
                var = jnp.maximum(sumsq_ref[...] * inv_n - mean * mean, 0.0)
                scale = g_ref[...] * jax.lax.rsqrt(var + EPS)
                scale_ref[...] = scale
                shift_ref[...] = bta_ref[...] - mean * scale

            h = h_scr[i].astype(jnp.float32)
            a = jnp.maximum(h * scale_ref[...] + shift_ref[...], 0.0)
            y = jnp.dot(a.astype(w2_ref.dtype), w2_ref[...],
                        preferred_element_type=jnp.float32)
            o_ref[...] = (y + b2_ref[...]).astype(o_ref.dtype)

    # VMEM budget estimate (double-buffered x / y tiles, resident weights,
    # persistent h scratch) and guard.
    est = (2 * tn * in_dim * 4
           + 2 * in_dim * hidden * cbytes
           + 2 * hidden * out_dim * cbytes
           + 2 * tn * out_dim * obytes
           + n_tiles * tn * hidden * cbytes
           + 8 * hidden * 4 + 2 * out_dim * 4)
    vlimit = _vmem_limit(est)
    if est > vlimit:
        # TODO(synk): fall back to a two-pass HBM h-stash pipeline for batches whose h does not fit VMEM.
        raise ValueError(f"batch too large for fused VMEM h-stash: need ~{est} B, limit {vlimit} B")

    y = pl.pallas_call(
        kernel,
        grid=(2, n_tiles),
        in_specs=[
            pl.BlockSpec((tn, in_dim), lambda p, i: ((1 - p) * i, 0)),   # x (f32, cast in kernel)
            pl.BlockSpec((in_dim, hidden), lambda p, i: (0, 0)),         # W1 (resident)
            pl.BlockSpec((1, hidden), lambda p, i: (0, 0)),              # b1
            pl.BlockSpec((1, hidden), lambda p, i: (0, 0)),              # gamma
            pl.BlockSpec((1, hidden), lambda p, i: (0, 0)),              # beta
            pl.BlockSpec((hidden, out_dim), lambda p, i: (0, 0)),        # W2 (resident)
            pl.BlockSpec((1, out_dim), lambda p, i: (0, 0)),             # b2
        ],
        out_specs=pl.BlockSpec((tn, out_dim), lambda p, i: (p * i, 0)),
        out_shape=jax.ShapeDtypeStruct((N, out_dim), out_dtype),
        scratch_shapes=[
            pltpu.VMEM((n_tiles, tn, hidden), compute_dtype),   # h stash (persistent)
            pltpu.VMEM((1, hidden), jnp.float32),               # column sum
            pltpu.VMEM((1, hidden), jnp.float32),               # column sum of squares
            pltpu.VMEM((1, hidden), jnp.float32),               # folded BN scale
            pltpu.VMEM((1, hidden), jnp.float32),               # folded BN shift
        ],
        compiler_params=pltpu.CompilerParams(
            dimension_semantics=("arbitrary", "arbitrary"),
            vmem_limit_bytes=vlimit),
        cost_estimate=pl.CostEstimate(
            flops=2 * N * in_dim * hidden + 2 * N * hidden * out_dim,
            transcendentals=0,
            bytes_accessed=(N * in_dim * 4 + in_dim * hidden * cbytes
                            + hidden * out_dim * cbytes + N * out_dim * obytes
                            + 8 * hidden * 4 + out_dim * 4)),
    )(x, w1c, b1f, gmf, btf, w2c, b2f)
    return y


# ---------------------------------------------------------------------------
# Parameter init (PyTorch-style) and pure-JAX reference of the module
# ---------------------------------------------------------------------------
def init_params(key, in_dim, hidden_dim, out_dim):
    k1, k2, k3, k4 = jax.random.split(key, 4)
    s1 = 1.0 / jnp.sqrt(in_dim)
    s2 = 1.0 / jnp.sqrt(hidden_dim)
    w1_t = jax.random.uniform(k1, (in_dim, hidden_dim), jnp.float32, -s1, s1)
    b1 = jax.random.uniform(k2, (1, hidden_dim), jnp.float32, -s1, s1)
    gamma = jnp.ones((1, hidden_dim), jnp.float32)
    beta = jnp.zeros((1, hidden_dim), jnp.float32)
    w2_t = jax.random.uniform(k3, (hidden_dim, out_dim), jnp.float32, -s2, s2)
    b2 = jax.random.uniform(k4, (1, out_dim), jnp.float32, -s2, s2)
    return w1_t, b1, gamma, beta, w2_t, b2


def reference(x, w1_t, b1, gamma, beta, w2_t, b2):
    h = x @ w1_t + b1
    mean = h.mean(axis=0, keepdims=True)
    var = ((h - mean) ** 2).mean(axis=0, keepdims=True)   # biased var (PyTorch BN)
    h = (h - mean) / jnp.sqrt(var + EPS) * gamma + beta
    h = jnp.maximum(h, 0.0)
    return h @ w2_t + b2


if __name__ == "__main__":
    # Small shapes consistent with the module (defaults in=2048, hidden=512, out=2048).
    # N=200 is deliberately not a multiple of the tile size to exercise the
    # cdiv grid + masked last tile.
    N, in_dim, hidden_dim, out_dim = 200, 256, 128, 256

    key = jax.random.PRNGKey(0)
    kx, kp = jax.random.split(key)
    x = jax.random.normal(kx, (N, in_dim), jnp.float32)
    params = init_params(kp, in_dim, hidden_dim, out_dim)
    ref = reference(x, *params)

    # bf16 MXU path with bf16 output (default perf configuration).
    out_bf16 = jax.block_until_ready(
        byol_prediction_mlp(x, *params, tile_n=128,
                            compute_dtype=jnp.bfloat16, out_dtype=jnp.bfloat16))
    assert out_bf16.shape == (N, out_dim) and out_bf16.dtype == jnp.bfloat16
    assert jnp.allclose(out_bf16.astype(jnp.float32), ref, atol=7e-2, rtol=7e-2), \
        "bf16 kernel mismatch"

    # f32 path: tight fidelity check against the PyTorch-equivalent reference.
    out_f32 = jax.block_until_ready(
        byol_prediction_mlp(x, *params, tile_n=64,
                            compute_dtype=jnp.float32, out_dtype=jnp.float32))
    assert jnp.allclose(out_f32, ref, atol=1e-4, rtol=1e-4), "f32 kernel mismatch"

    print("KERNEL_OK")
</pallas_src>

<mosaic_0001>
module attributes {stable_mosaic.version = 11 : i64} {
  func.func @kernel(%arg0: i32, %arg1: i32, %arg2: memref<128x256xf32, #tpu.memory_space<vmem>>, %arg3: memref<256x128xbf16, #tpu.memory_space<vmem>>, %arg4: memref<1x128xf32, #tpu.memory_space<vmem>>, %arg5: memref<1x128xf32, #tpu.memory_space<vmem>>, %arg6: memref<1x128xf32, #tpu.memory_space<vmem>>, %arg7: memref<128x256xbf16, #tpu.memory_space<vmem>>, %arg8: memref<1x256xf32, #tpu.memory_space<vmem>>, %arg9: memref<128x256xbf16, #tpu.memory_space<vmem>>, %arg10: memref<2x128x128xbf16, #tpu.memory_space<vmem>>, %arg11: memref<1x128xf32, #tpu.memory_space<vmem>>, %arg12: memref<1x128xf32, #tpu.memory_space<vmem>>, %arg13: memref<1x128xf32, #tpu.memory_space<vmem>>, %arg14: memref<1x128xf32, #tpu.memory_space<vmem>>) attributes {dimension_semantics = [#tpu.dimension_semantics<arbitrary>, #tpu.dimension_semantics<arbitrary>], iteration_bounds = array<i64: 2, 2>, scalar_prefetch = 0 : i64, scratch_operands = 5 : i64, tpu.core_type = #tpu.core_type<tc>, window_params = [{transform_indices = @transform_0, window_bounds = array<i64: 128, 256>}, {pipeline_mode = #tpu.pipeline_mode<synchronous>, transform_indices = @transform_1, window_bounds = array<i64: 256, 128>}, {pipeline_mode = #tpu.pipeline_mode<synchronous>, transform_indices = @transform_2, window_bounds = array<i64: 1, 128>}, {pipeline_mode = #tpu.pipeline_mode<synchronous>, transform_indices = @transform_3, window_bounds = array<i64: 1, 128>}, {pipeline_mode = #tpu.pipeline_mode<synchronous>, transform_indices = @transform_4, window_bounds = array<i64: 1, 128>}, {pipeline_mode = #tpu.pipeline_mode<synchronous>, transform_indices = @transform_5, window_bounds = array<i64: 128, 256>}, {pipeline_mode = #tpu.pipeline_mode<synchronous>, transform_indices = @transform_6, window_bounds = array<i64: 1, 256>}, {transform_indices = @transform_7, window_bounds = array<i64: 128, 256>}]} {
    %c0_i32 = arith.constant 0 : i32
    %0 = arith.cmpi eq, %arg0, %c0_i32 : i32
    %1 = arith.extui %0 : i1 to i32
    %c0_i32_0 = arith.constant 0 : i32
    %2 = arith.cmpi ne, %1, %c0_i32_0 : i32
    scf.if %2 {
      %c0_i32_2 = arith.constant 0 : i32
      %6 = arith.cmpi eq, %arg1, %c0_i32_2 : i32
      %7 = arith.extui %6 : i1 to i32
      %c0_i32_3 = arith.constant 0 : i32
      %8 = arith.cmpi ne, %7, %c0_i32_3 : i32
      scf.if %8 {
        %cst_22 = arith.constant 0.000000e+00 : f32
        %42 = vector.broadcast %cst_22 : f32 to vector<1x128xf32>
        %c0_23 = arith.constant 0 : index
        %c0_24 = arith.constant 0 : index
        %43 = vector.load %arg11[%c0_23, %c0_24] : memref<1x128xf32, #tpu.memory_space<vmem>>, vector<1x128xf32>
        tpu.vector_store %arg11[%c0_23, %c0_24], %42 {strides = array<i32>} : memref<1x128xf32, #tpu.memory_space<vmem>>, vector<1x128xf32>,
        %cst_25 = arith.constant 0.000000e+00 : f32
        %44 = vector.broadcast %cst_25 : f32 to vector<1x128xf32>
        %c0_26 = arith.constant 0 : index
        %c0_27 = arith.constant 0 : index
        %45 = vector.load %arg12[%c0_26, %c0_27] : memref<1x128xf32, #tpu.memory_space<vmem>>, vector<1x128xf32>
        tpu.vector_store %arg12[%c0_26, %c0_27], %44 {strides = array<i32>} : memref<1x128xf32, #tpu.memory_space<vmem>>, vector<1x128xf32>,
      } else {
      }
      %c0 = arith.constant 0 : index
      %c0_4 = arith.constant 0 : index
      %9 = vector.load %arg2[%c0, %c0_4] : memref<128x256xf32, #tpu.memory_space<vmem>>, vector<128x256xf32>
      %10 = arith.truncf %9 : vector<128x256xf32> to vector<128x256xbf16>
      %c0_5 = arith.constant 0 : index
      %c0_6 = arith.constant 0 : index
      %11 = vector.load %arg3[%c0_5, %c0_6] : memref<256x128xbf16, #tpu.memory_space<vmem>>, vector<256x128xbf16>
      %cst = arith.constant dense<0.000000e+00> : vector<128x128xf32>
      %12 = tpu.matmul %10, %11, %cst {dimension_numbers = #tpu.dot_dimension_numbers<[1], [0], [0], [1], [0, 0, 1, 1], [], []>} : vector<128x256xbf16>, vector<256x128xbf16>, vector<128x128xf32> -> vector<128x128xf32>
      %c0_7 = arith.constant 0 : index
      %c0_8 = arith.constant 0 : index
      %13 = vector.load %arg4[%c0_7, %c0_8] : memref<1x128xf32, #tpu.memory_space<vmem>>, vector<1x128xf32>
      %14 = vector.broadcast %13 : vector<1x128xf32> to vector<128x128xf32>
      %15 = arith.addf %12, %14 : vector<128x128xf32>
      %16 = tpu.iota {dimensions = array<i32: 0>} : vector<128x1xi32>
      %c128_i32 = arith.constant 128 : i32
      %17 = arith.muli %arg1, %c128_i32 : i32
      %18 = vector.broadcast %17 : i32 to vector<128x1xi32>
      %19 = arith.addi %16, %18 : vector<128x1xi32>
      %c200_i32 = arith.constant 200 : i32
      %20 = vector.broadcast %c200_i32 : i32 to vector<128x1xi32>
      %21 = arith.cmpi slt, %19, %20 : vector<128x1xi32>
      %cst_9 = arith.constant 0.000000e+00 : f32
      %22 = vector.shape_cast %21 : vector<128x1xi1> to vector<128x1xi1>
      %23 = vector.broadcast %22 : vector<128x1xi1> to vector<128x128xi1>
      %24 = vector.broadcast %cst_9 : f32 to vector<128x128xf32>
      %25 = arith.select %23, %15, %24 : vector<128x128xi1>, vector<128x128xf32>
      %26 = arith.truncf %25 : vector<128x128xf32> to vector<128x128xbf16>
      %27 = arith.index_cast %arg1 : i32 to index
      %c0_10 = arith.constant 0 : index
      %c0_11 = arith.constant 0 : index
      %28 = vector.load %arg10[%27, %c0_10, %c0_11] : memref<2x128x128xbf16, #tpu.memory_space<vmem>>, vector<1x128x128xbf16>
      %29 = vector.shape_cast %28 : vector<1x128x128xbf16> to vector<128x128xbf16>
      %30 = vector.shape_cast %26 : vector<128x128xbf16> to vector<1x128x128xbf16>
      tpu.vector_store %arg10[%27, %c0_10, %c0_11], %30 {strides = array<i32>} : memref<2x128x128xbf16, #tpu.memory_space<vmem>>, vector<1x128x128xbf16>,
      %c0_12 = arith.constant 0 : index
      %c0_13 = arith.constant 0 : index
      %31 = vector.load %arg11[%c0_12, %c0_13] : memref<1x128xf32, #tpu.memory_space<vmem>>, vector<1x128xf32>
      %cst_14 = arith.constant dense<0.000000e+00> : vector<128xf32>
      %32 = vector.multi_reduction <add>, %25, %cst_14 [0] : vector<128x128xf32> to vector<128xf32>
      %33 = vector.shape_cast %32 : vector<128xf32> to vector<1x128xf32>
      %34 = arith.addf %31, %33 : vector<1x128xf32>
      %c0_15 = arith.constant 0 : index
      %c0_16 = arith.constant 0 : index
      %35 = vector.load %arg11[%c0_15, %c0_16] : memref<1x128xf32, #tpu.memory_space<vmem>>, vector<1x128xf32>
      tpu.vector_store %arg11[%c0_15, %c0_16], %34 {strides = array<i32>} : memref<1x128xf32, #tpu.memory_space<vmem>>, vector<1x128xf32>,
      %c0_17 = arith.constant 0 : index
      %c0_18 = arith.constant 0 : index
      %36 = vector.load %arg12[%c0_17, %c0_18] : memref<1x128xf32, #tpu.memory_space<vmem>>, vector<1x128xf32>
      %37 = arith.mulf %25, %25 : vector<128x128xf32>
      %cst_19 = arith.constant dense<0.000000e+00> : vector<128xf32>
      %38 = vector.multi_reduction <add>, %37, %cst_19 [0] : vector<128x128xf32> to vector<128xf32>
      %39 = vector.shape_cast %38 : vector<128xf32> to vector<1x128xf32>
      %40 = arith.addf %36, %39 : vector<1x128xf32>
      %c0_20 = arith.constant 0 : index
      %c0_21 = arith.constant 0 : index
      %41 = vector.load %arg12[%c0_20, %c0_21] : memref<1x128xf32, #tpu.memory_space<vmem>>, vector<1x128xf32>
      tpu.vector_store %arg12[%c0_20, %c0_21], %40 {strides = array<i32>} : memref<1x128xf32, #tpu.memory_space<vmem>>, vector<1x128xf32>,
    } else {
    }
    %c1_i32 = arith.constant 1 : i32
    %3 = arith.cmpi eq, %arg0, %c1_i32 : i32
    %4 = arith.extui %3 : i1 to i32
    %c0_i32_1 = arith.constant 0 : i32
    %5 = arith.cmpi ne, %4, %c0_i32_1 : i32
    scf.if %5 {
      %c0_i32_2 = arith.constant 0 : i32
      %6 = arith.cmpi eq, %arg1, %c0_i32_2 : i32
      %7 = arith.extui %6 : i1 to i32
      %c0_i32_3 = arith.constant 0 : i32
      %8 = arith.cmpi ne, %7, %c0_i32_3 : i32
      scf.if %8 {
        %c0_16 = arith.constant 0 : index
        %c0_17 = arith.constant 0 : index
        %29 = vector.load %arg11[%c0_16, %c0_17] : memref<1x128xf32, #tpu.memory_space<vmem>>, vector<1x128xf32>
        %cst_18 = arith.constant 5.000000e-03 : f32
        %30 = vector.broadcast %cst_18 : f32 to vector<1x128xf32>
        %31 = arith.mulf %29, %30 : vector<1x128xf32>
        %c0_19 = arith.constant 0 : index
        %c0_20 = arith.constant 0 : index
        %32 = vector.load %arg12[%c0_19, %c0_20] : memref<1x128xf32, #tpu.memory_space<vmem>>, vector<1x128xf32>
        %cst_21 = arith.constant 5.000000e-03 : f32
        %33 = vector.broadcast %cst_21 : f32 to vector<1x128xf32>
        %34 = arith.mulf %32, %33 : vector<1x128xf32>
        %35 = arith.mulf %31, %31 : vector<1x128xf32>
        %36 = arith.subf %34, %35 : vector<1x128xf32>
        %cst_22 = arith.constant 0.000000e+00 : f32
        %37 = vector.broadcast %cst_22 : f32 to vector<1x128xf32>
        %38 = arith.maximumf %36, %37 : vector<1x128xf32>
        %c0_23 = arith.constant 0 : index
        %c0_24 = arith.constant 0 : index
        %39 = vector.load %arg5[%c0_23, %c0_24] : memref<1x128xf32, #tpu.memory_space<vmem>>, vector<1x128xf32>
        %cst_25 = arith.constant 9.99999974E-6 : f32
        %40 = vector.broadcast %cst_25 : f32 to vector<1x128xf32>
        %41 = arith.addf %38, %40 : vector<1x128xf32>
        %42 = math.rsqrt %41 : vector<1x128xf32>
        %43 = arith.mulf %39, %42 : vector<1x128xf32>
        %c0_26 = arith.constant 0 : index
        %c0_27 = arith.constant 0 : index
        %44 = vector.load %arg13[%c0_26, %c0_27] : memref<1x128xf32, #tpu.memory_space<vmem>>, vector<1x128xf32>
        tpu.vector_store %arg13[%c0_26, %c0_27], %43 {strides = array<i32>} : memref<1x128xf32, #tpu.memory_space<vmem>>, vector<1x128xf32>,
        %c0_28 = arith.constant 0 : index
        %c0_29 = arith.constant 0 : index
        %45 = vector.load %arg6[%c0_28, %c0_29] : memref<1x128xf32, #tpu.memory_space<vmem>>, vector<1x128xf32>
        %46 = arith.mulf %31, %43 : vector<1x128xf32>
        %47 = arith.subf %45, %46 : vector<1x128xf32>
        %c0_30 = arith.constant 0 : index
        %c0_31 = arith.constant 0 : index
        %48 = vector.load %arg14[%c0_30, %c0_31] : memref<1x128xf32, #tpu.memory_space<vmem>>, vector<1x128xf32>
        tpu.vector_store %arg14[%c0_30, %c0_31], %47 {strides = array<i32>} : memref<1x128xf32, #tpu.memory_space<vmem>>, vector<1x128xf32>,
      } else {
      }
      %9 = arith.index_cast %arg1 : i32 to index
      %c0 = arith.constant 0 : index
      %c0_4 = arith.constant 0 : index
      %10 = vector.load %arg10[%9, %c0, %c0_4] : memref<2x128x128xbf16, #tpu.memory_space<vmem>>, vector<1x128x128xbf16>
      %11 = vector.shape_cast %10 : vector<1x128x128xbf16> to vector<128x128xbf16>
      %12 = arith.extf %11 : vector<128x128xbf16> to vector<128x128xf32>
      %c0_5 = arith.constant 0 : index
      %c0_6 = arith.constant 0 : index
      %13 = vector.load %arg13[%c0_5, %c0_6] : memref<1x128xf32, #tpu.memory_space<vmem>>, vector<1x128xf32>
      %14 = vector.broadcast %13 : vector<1x128xf32> to vector<128x128xf32>
      %15 = arith.mulf %12, %14 : vector<128x128xf32>
      %c0_7 = arith.constant 0 : index
      %c0_8 = arith.constant 0 : index
      %16 = vector.load %arg14[%c0_7, %c0_8] : memref<1x128xf32, #tpu.memory_space<vmem>>, vector<1x128xf32>
      %17 = vector.broadcast %16 : vector<1x128xf32> to vector<128x128xf32>
      %18 = arith.addf %15, %17 : vector<128x128xf32>
      %cst = arith.constant 0.000000e+00 : f32
      %19 = vector.broadcast %cst : f32 to vector<128x128xf32>
      %20 = arith.maximumf %18, %19 : vector<128x128xf32>
      %21 = arith.truncf %20 : vector<128x128xf32> to vector<128x128xbf16>
      %c0_9 = arith.constant 0 : index
      %c0_10 = arith.constant 0 : index
      %22 = vector.load %arg7[%c0_9, %c0_10] : memref<128x256xbf16, #tpu.memory_space<vmem>>, vector<128x256xbf16>
      %cst_11 = arith.constant dense<0.000000e+00> : vector<128x256xf32>
      %23 = tpu.matmul %21, %22, %cst_11 {dimension_numbers = #tpu.dot_dimension_numbers<[1], [0], [0], [1], [0, 0, 1, 1], [], []>} : vector<128x128xbf16>, vector<128x256xbf16>, vector<128x256xf32> -> vector<128x256xf32>
      %c0_12 = arith.constant 0 : index
      %c0_13 = arith.constant 0 : index
      %24 = vector.load %arg8[%c0_12, %c0_13] : memref<1x256xf32, #tpu.memory_space<vmem>>, vector<1x256xf32>
      %25 = vector.broadcast %24 : vector<1x256xf32> to vector<128x256xf32>
      %26 = arith.addf %23, %25 : vector<128x256xf32>
      %27 = arith.truncf %26 : vector<128x256xf32> to vector<128x256xbf16>
      %c0_14 = arith.constant 0 : index
      %c0_15 = arith.constant 0 : index
      %28 = vector.load %arg9[%c0_14, %c0_15] : memref<128x256xbf16, #tpu.memory_space<vmem>>, vector<128x256xbf16>
      tpu.vector_store %arg9[%c0_14, %c0_15], %27 {strides = array<i32>} : memref<128x256xbf16, #tpu.memory_space<vmem>>, vector<128x256xbf16>,
    } else {
    }
    return
  }
  func.func @transform_0(%arg0: i32, %arg1: i32) -> (i32, i32) {
    %c1_i32 = arith.constant 1 : i32
    %0 = arith.subi %c1_i32, %arg0 : i32
    %1 = arith.muli %0, %arg1 : i32
    %c0_i32 = arith.constant 0 : i32
    %c0_i32_0 = arith.constant 0 : i32
    return %1, %c0_i32 : i32, i32
  }
  func.func @transform_1(%arg0: i32, %arg1: i32) -> (i32, i32) {
    %c0_i32 = arith.constant 0 : i32
    %c0_i32_0 = arith.constant 0 : i32
    %c0_i32_1 = arith.constant 0 : i32
    return %c0_i32, %c0_i32_0 : i32, i32
  }
  func.func @transform_2(%arg0: i32, %arg1: i32) -> (i32, i32) {
    %c0_i32 = arith.constant 0 : i32
    %c0_i32_0 = arith.constant 0 : i32
    %c0_i32_1 = arith.constant 0 : i32
    return %c0_i32, %c0_i32_0 : i32, i32
  }
  func.func @transform_3(%arg0: i32, %arg1: i32) -> (i32, i32) {
    %c0_i32 = arith.constant 0 : i32
    %c0_i32_0 = arith.constant 0 : i32
    %c0_i32_1 = arith.constant 0 : i32
    return %c0_i32, %c0_i32_0 : i32, i32
  }
  func.func @transform_4(%arg0: i32, %arg1: i32) -> (i32, i32) {
    %c0_i32 = arith.constant 0 : i32
    %c0_i32_0 = arith.constant 0 : i32
    %c0_i32_1 = arith.constant 0 : i32
    return %c0_i32, %c0_i32_0 : i32, i32
  }
  func.func @transform_5(%arg0: i32, %arg1: i32) -> (i32, i32) {
    %c0_i32 = arith.constant 0 : i32
    %c0_i32_0 = arith.constant 0 : i32
    %c0_i32_1 = arith.constant 0 : i32
    return %c0_i32, %c0_i32_0 : i32, i32
  }
  func.func @transform_6(%arg0: i32, %arg1: i32) -> (i32, i32) {
    %c0_i32 = arith.constant 0 : i32
    %c0_i32_0 = arith.constant 0 : i32
    %c0_i32_1 = arith.constant 0 : i32
    return %c0_i32, %c0_i32_0 : i32, i32
  }
  func.func @transform_7(%arg0: i32, %arg1: i32) -> (i32, i32) {
    %0 = arith.muli %arg0, %arg1 : i32
    %c0_i32 = arith.constant 0 : i32
    %c0_i32_0 = arith.constant 0 : i32
    return %0, %c0_i32 : i32, i32
  }
}

</mosaic_0001>

<bundles_post_ra>
// kernel: tpu_custom_call.1
= control target key start
LH: loop header
LB: loop body
LE: loop exit
PB: predicated region body
PF: predicated region fallthrough
CT: control target
= control target key end

     0   :  { %s2802_s0 = inlined_call_operand.hbm [shape: f32[200,256], index: 0, kind: input, shape index: {}]   ;;  %s2803_s1 = inlined_call_operand.hbm [shape: bf16[256,128], index: 1, kind: input, shape index: {}]   ;;  %s2804_s2 = inlined_call_operand.vmem [shape: f32[1,128], index: 2, kind: input, shape index: {}]   ;;  %s2805_s3 = inlined_call_operand.hbm [shape: f32[1,128], index: 3, kind: input, shape index: {}]   ;;  %s2806_s4 = inlined_call_operand.hbm [shape: f32[1,128], index: 4, kind: input, shape index: {}]   ;;  %s2807_s5 = inlined_call_operand.hbm [shape: bf16[128,256], index: 5, kind: input, shape index: {}]   ;;  %s2808_s6 = inlined_call_operand.vmem [shape: f32[1,256], index: 6, kind: input, shape index: {}]   ;;  %s2809_s7 = inlined_call_operand.hbm [shape: bf16[200,256], index: 7, kind: output, shape index: {}]  }
   0x1   :  { %2817 = sst [smem:[#allocation30_spill]] %s2803_s1 }
   0x2   :  { %2818 = sst [smem:[#allocation31_spill]] %s2804_s2 }
   0x3   :  { %2819 = sst [smem:[#allocation32_spill]] %s2806_s4 }
   0x4   :  { %2820 = sst [smem:[#allocation33_spill]] %s2808_s6 }
   0x5   :  { %2821 = sst [smem:[#allocation34_spill]] %s2809_s7 }
   0x6   :  { %12 = vsyncpa [#allocation8], 0 }
   0x7   :  { %14 = vsyncpa [#allocation8 + $0x1], 0 }
   0x8   :  { %15 = vsyncpa [#allocation11], 0 }
   0x9   :  { %16 = vsyncpa [#allocation14], 0 }
   0xa   :  { %17 = vsyncpa [#allocation9], 0 }
   0xb   :  { %19 = vsyncpa [#allocation9 + $0x1], 0  ;;  %s2244_s24 = smov 0   ;;  %s2246_s25 = smov 0  }
   0xc   :  { %s2248_s26 = smov 0   ;;  %s2250_s27 = smov 0  }
   0xd   :  { %s2252_s28 = smov 0   ;;  %s2254_s29 = smov 0  }
   0xe   :  { %s2256_s30 = smov 0   ;;  %s2258_s8 = smov 0  }
   0xf   :  { %s2260_s9 = smov 0   ;;  %s2262_s10 = smov 0  }
  0x10   :  { %s2264_s11 = smov 0  }
  0x11 LB: > { %2822 = sst [smem:[#allocation21_spill]] %s2155_s26  ;;  %s1407_s12 = sadd.s32 4294967295, %s2187_s11   ;;  %s2187_s11 = sphi %s2264_s11, %s25_s11   ;;  %s2183_s10 = sphi %s2262_s10, %s2860_s10   ;;  %s2179_s9 = sphi %s2260_s9, %s2859_s9   ;;  %s2175_s8 = sphi %s2258_s8, %s2866_s8   ;;  %s2171_s30 = sphi %s2256_s30, %s2857_s30   ;;  %s2167_s29 = sphi %s2254_s29, %s2865_s29   ;;  %s2163_s28 = sphi %s2252_s28, %s2864_s28   ;;  %s2159_s27 = sphi %s2250_s27, %s2863_s27   ;;  %s2155_s26 = sphi %s2248_s26, %s2855_s26   ;;  %s2151_s25 = sphi %s2246_s25, %s2862_s25   ;;  %s2147_s24 = sphi %s2244_s24, %s2861_s24  }
  0x12   : > { %2823 = sst [smem:[#allocation22_spill]] %s2171_s30  ;;  %s34_s14 = sadd.s32 1, %s2179_s9 }
  0x13   : > { %2824 = sst [smem:[#allocation23_spill]] %s2175_s8  ;;  %s37_s15 = sadd.s32 1, %s2183_s10 }
  0x14   : > { %2825 = sst [smem:[#allocation24_spill]] %s2179_s9  ;;  %p35_p0 = scmp.ge.s32.totalorder %s34_s14, 2 }
  0x15   : > { %2826 = sst [smem:[#allocation25_spill]] %s2183_s10  ;;  %s41_s16 = ssub.s32 1, %s2183_s10 }
  0x16   : > { %s2303_s17 = smul.u32 %s2179_s9, %s41_s16  ;;  %s48_s18 = sadd.s32 1, %s2167_s29 }
  0x17   : > { %s2868_s14 = smov (%p35_p0, %s34_s14), 0  ;;  %s2870_s15 = smov (!%p35_p0, %s37_s15), %s2183_s10 }
  0x18   : > { %2827 = sst [smem:[#allocation26_spill]] %s2868_s14  ;;  %p55_p1 = scmp.ne.s32.totalorder %s2167_s29, %s2163_s28 }
  0x19   : > { %p56_p2 = scmp.eq.s32.totalorder %s2187_s11, 0  ;;  %p39_p3 = scmp.ge.s32.totalorder %s2870_s15, 2 }
  0x1a   : > { %p61_p4 = scmp.ne.s32.totalorder %s2163_s28, %s2159_s27  ;;  %p2317_p6 = scmp.eq.s32.totalorder %s1407_s12, 0 }
  0x1b   : > { %p2313_p5 = por %p56_p2, %p55_p1  ;;  %s2872_s15 = smov (%p39_p3, %s2870_s15), 0 }
  0x1c   : > { %2830 = sst [smem:[#allocation27_spill]] %s2872_s15  ;;  %p2325_p7 = por %p2317_p6, %p61_p4 }
  0x1d   : > { %s197_s22 = smul.u32 %s2179_s9, %s2183_s10  ;;  %s43_s23 = ssub.s32 1, %s2872_s15 }
  0x1e   : > { %s198_s27 = smul.u32 %s2872_s15, %s2868_s14  ;;  %s202_s13 = sadd.s32 1, %s2155_s26 }
  0x1f   : > { %s44_s16 = smul.u32 %s43_s23, %s2868_s14  ;;  %p212_p8 = scmp.ne.s32.totalorder %s2155_s26, %s2151_s25 }
  0x20   : > { %s199_s7 = ssub.s32 %s197_s22, %s198_s27  ;;  %p213_p11 = scmp.eq.s32.totalorder %s1407_s12, 3 }
  0x21   : > { %s45_s6 = ssub.s32 %s2303_s17, %s44_s16  ;;  %p200_p9 = scmp.eq.s32.totalorder %s199_s7, 0 }
  0x22   : > { %p46_p10 = scmp.eq.s32.totalorder %s45_s6, 0  ;;  %p2345_p12 = por %p213_p11, %p212_p8 }
  0x23   : > { %s2340_s2 = scalar_select %p200_p9, %s2155_s26, %s202_s13  }
  0x24   : > { %s2343_s30 = scalar_select %p46_p10, %s2167_s29, %s48_s18  }
  0x25   : > { %2832 = sst [smem:[#allocation28_spill]] %s2340_s2  ;;  %p218_p13 = scmp.ne.s32.totalorder %s2151_s25, %s2147_s24 }
  0x26   : > { %2833 = sst [smem:[#allocation29_spill]] %s2343_s30  ;;  %s2835_s10 = sadd.s32 4294967294, %s2187_s11  }
  0x27   : > { %p219_p0 = scmp.eq.s32.totalorder %s2835_s10, 3  ;;  %p1409_p1 = scmp.ge.s32.totalorder %s2187_s11, 1 }
  0x28   : > { %p226_p2 = scmp.lt.s32.totalorder %s2187_s11, 5  ;;  %s2837_s1 = sld [smem:[#allocation30_spill]] }
  0x29   : > { %p2355_p3 = por %p219_p0, %p218_p13  ;;  %s2189_s18 = smov [#allocation10]  }
  0x2a   : > { %p2362_p4 = pnand %p1409_p1, %p226_p2  ;;  %s239_s10 = sshll.u32 %s2189_s18, 4  ;;  %s240_s10 = int_to_ptr.vmem [resolvable:$true] %s239_s10 }
  0x2b   : > { %s2840_s4 = sld [smem:[#allocation32_spill]]  ;;  %s2190_s7 = smov [#allocation13]  }
  0x2c   : > { %p1755_p8 = pneg %p2362_p4  ;;  %s2191_s15 = smov 64  }
  0x2d   : > { %s2192_s14 = smov 4   ;;  %s255_s30 = sshll.u32 %s2805_s3, 4  ;;  %s256_s30 = int_to_ptr.hbm [resolvable:$true] %s255_s30 }
  0x2e   : > { %s237_s12 = sshll.u32 %s2837_s1, 4  ;;  %p2370_p9 = pnand %p1755_p8, %p2317_p6  ;;  %s238_s12 = int_to_ptr.hbm [resolvable:$true] %s237_s12 }
  0x2f   : > { %s269_s1 = sshll.u32 %s2190_s7, 4  ;;  %s2193_s27 = smov [#allocation12]   ;;  %s270_s1 = int_to_ptr.vmem [resolvable:$true] %s269_s1 }
  0x30   : > { %1758 = dma.hbm_to_vmem [thread:$0]  (!%p2370_p9), %s238_s12, 2048, %s240_s10, [#allocation11], %s2191_s15, %s2191_s15, %s2192_s14  }
  0x31   : > { %s267_s6 = sshll.u32 %s2840_s4, 4  ;;  %s257_s16 = sshll.u32 %s2193_s27, 4  ;;  %s268_s6 = int_to_ptr.hbm [resolvable:$true] %s267_s6  ;;  %s258_s16 = int_to_ptr.vmem [resolvable:$true] %s257_s16 }
  0x32   : > { %1764 = dma.hbm_to_vmem [thread:$0]  (!%p2370_p9), %s268_s6, 16, %s270_s1, [#allocation14]  }
  0x33   : > { %s278_s26 = sshll.u32 %s2807_s5, 4  ;;  %s2194_s14 = smov [#allocation15]   ;;  %s279_s26 = int_to_ptr.hbm [resolvable:$true] %s278_s26 }
  0x34   : > { %1761 = dma.hbm_to_vmem [thread:$0]  (!%p2370_p9), %s256_s30, 16, %s258_s16, [#allocation11]  }
  0x35   : > { %s280_s15 = sshll.u32 %s2194_s14, 4  ;;  %s2195_s12 = smov 128   ;;  %s281_s15 = int_to_ptr.vmem [resolvable:$true] %s280_s15 }
  0x36   : > { %s2196_s10 = smov 8   ;;  %p1414_p10 = scmp.ge.s32.totalorder %s2187_s11, 4 }
  0x37   : > { %1767 = dma.hbm_to_vmem [thread:$0]  (!%p2370_p9), %s279_s26, 2048, %s281_s15, [#allocation14], %s2195_s12, %s2195_s12, %s2196_s10  }
  0x38   : > { %293 = sbr.rel (%p1414_p10) target bundleno = 97 (0x61), region = 40 }
  0x3d   : > { %296 = sbr.rel (!%p2313_p5) target bundleno = 97 (0x61), region = 44  ;;  %s297_s1 = sand.u32 (%p2313_p5), 1, %s2167_s29  }
  0x3e   : > { %s1416_s2 = sshll.u32 (%p2313_p5), %s2303_s17, 4  ;;  %s1415_s4 = sshll.u32 (%p2313_p5), %s297_s1, 8 }
  0x3f   : > { %s305_s9 = ssub.s32 (%p2313_p5), 25, %s1416_s2  ;;  %s2399_s26 = scalar_lea.sflag (%p2313_p5), [#allocation8], %s297_s1 }
  0x40   : > { %p306_p11 = scmp.lt.s32.totalorder (%p2313_p5), %s305_s9, 16  ;;  %s301_s7 = scalar_lea.vmem (%p2313_p5), [#allocation7], %s1415_s4 }
  0x42   : > { %s2874_s9 = smov (!%p306_p11, %s305_s9), 16 }
  0x43   : > { %s1579_s30 = sshll.u32 %s2874_s9, 4 }
  0x44   : > { %s310_s6 = ssub.s32 256, %s1579_s30 }
  0x45   : > { %s311_s23 = sshll.u32 %s310_s6, 4 }
  0x46   : > { %312 = vsyncadd %s2399_s26, %s311_s23  ;;  %p2402_p5 = scmp.ne.s32.totalorder %s1579_s30, 0  ;;  %s1581_s18 = sshll.u32 %s2303_s17, 8 }
  0x47   : > { %s316_s14 = scalar_lea.hbm %s2802_s0, %s1581_s18  ;;  %s2410_s15 = sshll.u32 %s301_s7, 4  ;;  %s321_s15 = int_to_ptr.vmem [resolvable:$true] %s2410_s15 }
  0x48   : > { %s318_s12 = sshll.u32 %s316_s14, 4  ;;  %s1423_s10 = sshll.u32 %s2874_s9, 8  ;;  %s2413_s12 = int_to_ptr.hbm [resolvable:$true] %s318_s12 }
  0x49   : > { %s2007_s1 = sshra.s32 %s2413_s12, 4  ;;  %s2009_s2 = sshrl.u32 %s1423_s10, 4  ;;  %s2008_s1 = int_to_ptr.hbm [resolvable:$true] %s2007_s1 }
  0x4a   : > { %s2014_s4 = scalar_lea.hbm %s2008_s1, %s2009_s2  ;;  %s2018_s6 = scalar_lea.hbm %s2802_s0, 400 }
  0x4b   : > { %p2015_p13 = scmp.ne.s32.totalorder %s2008_s1, %s2014_s4  ;;  %p2020_p2 = scmp.lt.s32.totalorder %s2018_s6, %s2014_s4 }
  0x4d   : > { %p2016_p0 = pnand %p2015_p13, %p2402_p5 }
  0x4f   : > { %p2017_p1 = pneg %p2016_p0 }
  0x51   : > { %p2022_p8 = pnand %p2020_p2, %p2017_p1 }
  0x53   : > { %2025 = shalt.err (!%p2022_p8)
}
  0x54   : > { %s2026_s23 = sshra.s32 %s321_s15, 4  ;;  %s2197_s18 = smov [#allocation7]   ;;  %s2027_s23 = int_to_ptr.vmem [resolvable:$true] %s2026_s23 }
  0x55   : > { %s2033_s7 = scalar_lea.vmem %s2027_s23, %s2009_s2  ;;  %s2037_s27 = scalar_lea.vmem %s2197_s18, 512 }
  0x56   : > { %p2034_p9 = scmp.ne.s32.totalorder %s2027_s23, %s2033_s7  ;;  %p2039_p13 = scmp.lt.s32.totalorder %s2037_s27, %s2033_s7 }
  0x58   : > { %p2035_p10 = pnand %p2034_p9, %p2402_p5 }
  0x5a   : > { %p2036_p11 = pneg %p2035_p10 }
  0x5c   : > { %p2041_p0 = pnand %p2039_p13, %p2036_p11 }
  0x5e   : > { %2044 = shalt.err (!%p2041_p0)
}
  0x5f   : > { %s2198_s16 = smov 256   ;;  %s2199_s14 = smov 16  }
  0x60   : > { %326 = dma.hbm_to_vmem [thread:$0]  (%p2402_p5), %s2413_s12, %s1423_s10, %s321_s15, %s2399_s26, %s2198_s16, %s2198_s16, %s2199_s14  }
  0x61 PF: > { %332 = sbr.rel (%p2362_p4) target bundleno = 713 (0x2c9), region = 48  ;;  %s334_s1 = sand.u32 (!%p2362_p4), 1, %s2163_s28  }
  0x62   : > { %s1425_s2 = sshll.u32 (!%p2362_p4), %s334_s1, 8  ;;  %s335_s4 = scalar_lea.sflag (!%p2362_p4), [#allocation8], %s334_s1 }
  0x63   : > { %s2439_s17 = scalar_lea.vmem (!%p2362_p4), [#allocation7], %s1425_s2 }
  0x66   : > { %2130 = dma.done.wait (%p2325_p7), %s335_s4, 4096  }
  0x67   : > { %2132 = vsyncadd (%p2325_p7), %s335_s4, 4294963200 }
  0x68   : > { %2134 = dma.done.wait (%p2317_p6), [#allocation11], 2064  }
  0x69   : > { %2136 = vsyncadd (%p2317_p6), [#allocation11], 4294965232 }
  0x6a   : > { %2138 = dma.done.wait (%p2317_p6), [#allocation14], 2064  }
  0x6b   : > { %2140 = vsyncadd (%p2317_p6), [#allocation14], 4294965232  ;;  %s387_s13 = sand.u32 1, %s2151_s25   ;;  %s2842_s21 = sld [smem:[#allocation23_spill]] }
  0x6c   : > { %s1430_s9 = sshll.u32 %s387_s13, 7 }
  0x6d   : > { %s2456_s26 = scalar_lea.vmem [#allocation16], %s1430_s9 }
  0x71   : > { %p1431_p7 = scmp.ne.s32.totalorder %s2842_s21, 0 }
  0x72   : > { %s2843_s19 = sld [smem:[#allocation22_spill]] (!%p1431_p7) }
  0x73   : > { %408 = sbr.rel (%p1431_p7) target bundleno = 384 (0x180), region = 72 }
  0x78   : > { %p1432_p4 = scmp.ne.s32.totalorder %s2843_s19, 0 }
  0x7a   : > { %412 = sbr.rel (%p1432_p4) target bundleno = 130 (0x82), region = 76 }
  0x7f   : > { %v2200_v0 = vmov 0.0  }
  0x80   : > { %413 = vst [vmem:[#allocation3] sm:$0x1] %v2200_v0 }
  0x81   : > { %414 = vst [vmem:[#allocation4] sm:$0x1] %v2200_v0 }
  0x82 PF: > { %v1589_v1 = vld [vmem:[#allocation10 + $0x38] sm:$0xff]  ;;  %v1588_v3 = vld [vmem:[#allocation10 + $0x30] sm:$0xff]  ;;  %v1587_v5 = vld [vmem:[#allocation10 + $0x28] sm:$0xff]  ;;  %s2844_s20 = sld [smem:[#allocation22_spill]] }
  0x83   : > { %v1597_v2 = vld [vmem:[#allocation10 + $0x78] sm:$0xff]  ;;  %595 = vmatpush.bf16.msra.mxu0 %v1589_v1  ;;  %v1596_v4 = vld [vmem:[#allocation10 + $0x70] sm:$0xff]  ;;  %1705 = vmatpush.bf16.msra.mxu2 %v1589_v1  ;;  %v1595_v6 = vld [vmem:[#allocation10 + $0x68] sm:$0xff]  ;;  %v693_v1 = vlaneseq  ;;  %s2845_s30 = sld [smem:[#allocation31_spill]] }
  0x84   : > { %644 = vmatpush.bf16.msra.mxu1 %v1597_v2  ;;  %1713 = vmatpush.bf16.msra.mxu3 %v1597_v2  ;;  %v1586_v7 = vld [vmem:[#allocation10 + $0x20] sm:$0xff]  ;;  %v1585_v9 = vld [vmem:[#allocation10 + $0x18] sm:$0xff]  ;;  %v1584_v11 = vld [vmem:[#allocation10 + $0x10] sm:$0xff] }
  0x85   : > { %v1594_v8 = vld [vmem:[#allocation10 + $0x60] sm:$0xff]  ;;  %v1593_v10 = vld [vmem:[#allocation10 + $0x58] sm:$0xff]  ;;  %v1592_v12 = vld [vmem:[#allocation10 + $0x50] sm:$0xff] }
  0x86   : > { %v1583_v13 = vld [vmem:[#allocation10 + $0x8] sm:$0xff]  ;;  %v1582_v15 = vld [vmem:[#allocation10] sm:$0xff]  ;;  %v417_v18 = vld [vmem:[%s2439_s17 + $0x10] sm:$0xff] }
  0x87   : > { %596 = vmatpush.bf16.msra.mxu0 %v1588_v3  ;;  %1706 = vmatpush.bf16.msra.mxu2 %v1588_v3  ;;  %v1591_v14 = vld [vmem:[#allocation10 + $0x48] sm:$0xff]  ;;  %v1590_v16 = vld [vmem:[#allocation10 + $0x40] sm:$0xff]  ;;  %v418_v20 = vld [vmem:[%s2439_s17 + $0x18] sm:$0xff] }
  0x88   : > { %645 = vmatpush.bf16.msra.mxu1 %v1596_v4  ;;  %1714 = vmatpush.bf16.msra.mxu3 %v1596_v4  ;;  %v415_v17 = vld [vmem:[%s2439_s17] sm:$0xff]  ;;  %v416_v19 = vld [vmem:[%s2439_s17 + $0x8] sm:$0xff]  ;;  %v433_v22 = vld [vmem:[%s2439_s17 + $0x90] sm:$0xff]  ;;  %v2492_v4 = vshrl.u32 %v693_v1, 7  ;;  %s1497_s15 = sshll.u32 %s2844_s20, 7  ;;  %s1598_s6 = sshll.u32 %s2844_s20, 6 }
  0x89   : > { %v431_v21 = vld [vmem:[%s2439_s17 + $0x80] sm:$0xff]  ;;  %v432_v23 = vld [vmem:[%s2439_s17 + $0x88] sm:$0xff]  ;;  %v434_v24 = vld [vmem:[%s2439_s17 + $0x98] sm:$0xff]  ;;  %v447_v25 = vpack.c.bf16 %v417_v18, %v415_v17  ;;  %v448_v26 = vpack.c.bf16 %v418_v20, %v416_v19  ;;  %s2520_s23 = scalar_lea.vmem [#allocation2], %s1598_s6 }
  0x8a   : > { %v455_v27 = vpack.c.bf16 %v433_v22, %v431_v21  ;;  %v456_v28 = vpack.c.bf16 %v434_v24, %v432_v23  ;;  %v419_v29 = vld [vmem:[%s2439_s17 + $0x20] sm:$0xff]  ;;  %v421_v30 = vld [vmem:[%s2439_s17 + $0x30] sm:$0xff]  ;;  %v420_v31 = vld [vmem:[%s2439_s17 + $0x28] sm:$0xff]  ;;  %v703_v18 = vadd.s32 72, %v2492_v4  ;;  %v699_v1 = vadd.s32 40, %v2492_v4 }
  0x8b   : > { %597 = vmatpush.bf16.msra.mxu0 %v1587_v5  ;;  %1707 = vmatpush.bf16.msra.mxu2 %v1587_v5  ;;  %v422_v32 = vld [vmem:[%s2439_s17 + $0x38] sm:$0xff]  ;;  %v435_v33 = vld [vmem:[%s2439_s17 + $0xa0] sm:$0xff]  ;;  %v437_v34 = vld [vmem:[%s2439_s17 + $0xb0] sm:$0xff]  ;;  %v449_v37 = vpack.c.bf16 %v421_v30, %v419_v29 }
  0x8c   : > { %646 = vmatpush.bf16.msra.mxu1 %v1595_v6  ;;  %1715 = vmatpush.bf16.msra.mxu3 %v1595_v6  ;;  %v436_v35 = vld [vmem:[%s2439_s17 + $0xa8] sm:$0xff]  ;;  %v438_v36 = vld [vmem:[%s2439_s17 + $0xb8] sm:$0xff]  ;;  %v450_v38 = vpack.c.bf16 %v422_v32, %v420_v31  ;;  %v457_v39 = vpack.c.bf16 %v437_v34, %v435_v33  ;;  %v423_v41 = vld [vmem:[%s2439_s17 + $0x40] sm:$0xff]  ;;  %v695_v6 = vadd.s32 8, %v2492_v4  ;;  %v696_v33 = vadd.s32 16, %v2492_v4 }
  0x8d   : > { %v458_v40 = vpack.c.bf16 %v438_v36, %v436_v35  ;;  %v425_v42 = vld [vmem:[%s2439_s17 + $0x50] sm:$0xff]  ;;  %v424_v43 = vld [vmem:[%s2439_s17 + $0x48] sm:$0xff]  ;;  %v426_v44 = vld [vmem:[%s2439_s17 + $0x58] sm:$0xff]  ;;  %v697_v35 = vadd.s32 24, %v2492_v4 }
  0x8e   : > { %v439_v45 = vld [vmem:[%s2439_s17 + $0xc0] sm:$0xff]  ;;  %v441_v46 = vld [vmem:[%s2439_s17 + $0xd0] sm:$0xff]  ;;  %v440_v47 = vld [vmem:[%s2439_s17 + $0xc8] sm:$0xff]  ;;  %v451_v49 = vpack.c.bf16 %v425_v42, %v423_v41  ;;  %v452_v50 = vpack.c.bf16 %v426_v44, %v424_v43  ;;  %v704_v43 = vadd.s32 80, %v2492_v4 }
  0x8f   : > { %598 = vmatpush.bf16.msra.mxu0 %v1586_v7  ;;  %1708 = vmatpush.bf16.msra.mxu2 %v1586_v7  ;;  %v442_v48 = vld [vmem:[%s2439_s17 + $0xd8] sm:$0xff]  ;;  %v459_v51 = vpack.c.bf16 %v441_v46, %v439_v45  ;;  %v427_v53 = vld [vmem:[%s2439_s17 + $0x60] sm:$0xff]  ;;  %v429_v54 = vld [vmem:[%s2439_s17 + $0x70] sm:$0xff]  ;;  %v2501_v7 = vstv %s1497_s15 }
  0x90   : > { %647 = vmatpush.bf16.msra.mxu1 %v1594_v8  ;;  %1716 = vmatpush.bf16.msra.mxu3 %v1594_v8  ;;  %v460_v52 = vpack.c.bf16 %v442_v48, %v440_v47  ;;  %v428_v55 = vld [vmem:[%s2439_s17 + $0x68] sm:$0xff]  ;;  %v430_v56 = vld [vmem:[%s2439_s17 + $0x78] sm:$0xff]  ;;  %v443_v57 = vld [vmem:[%s2439_s17 + $0xe0] sm:$0xff]  ;;  %v453_v61 = vpack.c.bf16 %v429_v54, %v427_v53  ;;  %v721_v24 = vadd.s32 %v2501_v7, %v703_v18  ;;  %v705_v48 = vadd.s32 88, %v2492_v4 }
  0x91   : > { %v445_v58 = vld [vmem:[%s2439_s17 + $0xf0] sm:$0xff]  ;;  %v444_v59 = vld [vmem:[%s2439_s17 + $0xe8] sm:$0xff]  ;;  %v446_v60 = vld [vmem:[%s2439_s17 + $0xf8] sm:$0xff]  ;;  %v454_v62 = vpack.c.bf16 %v430_v56, %v428_v55 }
  0x92   : > { %v461_v63 = vpack.c.bf16 %v445_v58, %v443_v57  ;;  %v462_v0 = vpack.c.bf16 %v446_v60, %v444_v59  ;;  %v2498_v5 = vld [vmem:[%s2845_s30] ss:$0 sm:$0xff]  ;;  %vm737_vm3 = vcmp.lt.s32.totalorder %v721_v24, 200  ;;  %v723_v54 = vadd.s32 %v2501_v7, %v705_v48 }
  0x93   : > { %599 = vmatpush.bf16.msra.mxu0 %v1585_v9  ;;  %1709 = vmatpush.bf16.msra.mxu2 %v1585_v9  ;;  %v712_v9 = vadd.s32 %v2501_v7, %v2492_v4 }
  0x94   : > { %648 = vmatpush.bf16.msra.mxu1 %v1593_v10  ;;  %1717 = vmatpush.bf16.msra.mxu3 %v1593_v10  ;;  %v713_v10 = vadd.s32 %v2501_v7, %v695_v6  ;;  %vm739_vm7 = vcmp.lt.s32.totalorder %v723_v54, 200 }
  0x95   : > { %vm728_vm0 = vcmp.lt.s32.totalorder %v712_v9, 200  ;;  %v717_v9 = vadd.s32 %v2501_v7, %v699_v1 }
  0x96   : > { %vm729_vm1 = vcmp.lt.s32.totalorder %v713_v10, 200 }
  0x97   : > { %600 = vmatpush.bf16.msra.mxu0 %v1584_v11  ;;  %1710 = vmatpush.bf16.msra.mxu2 %v1584_v11  ;;  %vm733_vm9 = vcmp.lt.s32.totalorder %v717_v9, 200 }
  0x98   : > { %649 = vmatpush.bf16.msra.mxu1 %v1592_v12  ;;  %1718 = vmatpush.bf16.msra.mxu3 %v1592_v12 }
  0x9b   : > { %601 = vmatpush.bf16.msra.mxu0 %v1583_v13  ;;  %1711 = vmatpush.bf16.msra.mxu2 %v1583_v13  ;;  %v702_v13 = vadd.s32 64, %v2492_v4 }
  0x9c   : > { %650 = vmatpush.bf16.msra.mxu1 %v1591_v14  ;;  %1719 = vmatpush.bf16.msra.mxu3 %v1591_v14 }
  0x9d   : > { %v720_v21 = vadd.s32 %v2501_v7, %v702_v13 }
  0x9f   : > { %602 = vmatpush.bf16.msra.mxu0 %v1582_v15  ;;  %1712 = vmatpush.bf16.msra.mxu2 %v1582_v15  ;;  %vm736_vm2 = vcmp.lt.s32.totalorder %v720_v21, 200  ;;  %v700_v21 = vadd.s32 48, %v2492_v4 }
  0xa0   : > { %651 = vmatpush.bf16.msra.mxu1 %v1590_v16  ;;  %1720 = vmatpush.bf16.msra.mxu3 %v1590_v16 }
  0xa2   : > { %603 = vmatmul.bf16.vlgmr.msra.gmra.mxu0 %v447_v25  ;;  %623 = vmatmul.bf16.vlgmr.msra.gmra.mxu2 %v455_v27 }
  0xa3   : > { %652 = vmatmul.bf16.vlgmr.msra.gmra.mxu1 %v448_v26  ;;  %672 = vmatmul.bf16.vlgmr.msra.gmra.mxu3 %v456_v28 }
  0xb2   : > { %608 = vmatmul.bf16.gmra.mxu0 %v449_v37  ;;  %628 = vmatmul.bf16.gmra.mxu2 %v457_v39  ;;  %v714_v39 = vadd.s32 %v2501_v7, %v696_v33 }
  0xb3   : > { %657 = vmatmul.bf16.gmra.mxu1 %v450_v38  ;;  %677 = vmatmul.bf16.gmra.mxu3 %v458_v40  ;;  %v715_v40 = vadd.s32 %v2501_v7, %v697_v35 }
  0xb4   : > { %vm730_vm4 = vcmp.lt.s32.totalorder %v714_v39, 200 }
  0xb5   : > { %vm731_vm5 = vcmp.lt.s32.totalorder %v715_v40, 200 }
  0xc2   : > { %613 = vmatmul.bf16.gmra.mxu0 %v451_v49  ;;  %633 = vmatmul.bf16.gmra.mxu2 %v459_v51  ;;  %v722_v51 = vadd.s32 %v2501_v7, %v704_v43 }
  0xc3   : > { %662 = vmatmul.bf16.gmra.mxu1 %v452_v50  ;;  %682 = vmatmul.bf16.gmra.mxu3 %v460_v52 }
  0xc4   : > { %vm738_vm6 = vcmp.lt.s32.totalorder %v722_v51, 200 }
  0xd2   : > { %618 = vmatmul.bf16.gmra.mxu0 %v453_v61  ;;  %638 = vmatmul.bf16.gmra.mxu2 %v461_v63  ;;  %v698_v63 = vadd.s32 32, %v2492_v4 }
  0xd3   : > { %667 = vmatmul.bf16.gmra.mxu1 %v454_v62  ;;  %687 = vmatmul.bf16.gmra.mxu3 %v462_v0 }
 0x11f   : > { %v604_v2 = vpop.f32.mrf.mxu0 }
 0x120   : > { %v653_v3 = vpop.f32.mrf.mxu1  ;;  %v605_v8 = vadd.f32 %v2498_v5, %v604_v2 }
 0x122   : > { %v654_v16 = vadd.f32 %v653_v3, %v605_v8  ;;  %v716_v8 = vadd.s32 %v2501_v7, %v698_v63 }
 0x124   : > { %v2513_v22 = vsel %vm728_vm0, %v654_v16, 0.0  ;;  %vm732_vm8 = vcmp.lt.s32.totalorder %v716_v8, 200 }
 0x125   : > { %v624_v11 = vpop.f32.mrf.mxu2 }
 0x126   : > { %v673_v12 = vpop.f32.mrf.mxu3  ;;  %v625_v19 = vadd.f32 %v2498_v5, %v624_v11 }
 0x127   : > { %v606_v14 = vpop.f32.mrf.mxu0 }
 0x128   : > { %v655_v15 = vpop.f32.mrf.mxu1  ;;  %v607_v17 = vadd.f32 %v2498_v5, %v606_v14  ;;  %v674_v26 = vadd.f32 %v673_v12, %v625_v19  ;;  %v706_v12 = vadd.s32 96, %v2492_v4 }
 0x12a   : > { %v656_v20 = vadd.f32 %v655_v15, %v607_v17  ;;  %v2524_v32 = vsel %vm736_vm2, %v674_v26, 0.0  ;;  %v707_v17 = vadd.s32 104, %v2492_v4 }
 0x12c   : > { %v2515_v23 = vsel %vm729_vm1, %v656_v20, 0.0  ;;  %v724_v20 = vadd.s32 %v2501_v7, %v706_v12  ;;  %v725_v26 = vadd.s32 %v2501_v7, %v707_v17 }
 0x12d   : > { %v1622_v25 = vpack.c.bf16 %v2515_v23, %v2513_v22  ;;  %v626_v27 = vpop.f32.mrf.mxu2 }
 0x12e   : > { %v675_v28 = vpop.f32.mrf.mxu3  ;;  %v627_v30 = vadd.f32 %v2498_v5, %v626_v27  ;;  %vm740_vm10 = vcmp.lt.s32.totalorder %v724_v20, 200  ;;  %vm741_vm11 = vcmp.lt.s32.totalorder %v725_v26, 200 }
 0x12f   : > { %1623 = vst [vmem:[%s2520_s23] sm:$0xff] %v1622_v25   ;;  %v609_v29 = vpop.f32.mrf.mxu0 }
 0x130   : > { %v658_v31 = vpop.f32.mrf.mxu1  ;;  %v676_v34 = vadd.f32 %v675_v28, %v627_v30  ;;  %v610_v37 = vadd.f32 %v2498_v5, %v609_v29  ;;  %v853_v29 = vmul.f32 %v2515_v23, %v2515_v23 }
 0x132   : > { %v2528_v36 = vsel %vm737_vm3, %v676_v34, 0.0  ;;  %v659_v46 = vadd.f32 %v658_v31, %v610_v37  ;;  %v718_v31 = vadd.s32 %v2501_v7, %v700_v21  ;;  %v860_v21 = vmul.f32 %v2524_v32, %v2524_v32 }
 0x133   : > { %v1642_v38 = vpack.c.bf16 %v2528_v36, %v2524_v32 }
 0x134   : > { %v2541_v52 = vsel %vm730_vm4, %v659_v46, 0.0  ;;  %vm734_vm12 = vcmp.lt.s32.totalorder %v718_v31, 200 }
 0x135   : > { %1694 = vst [vmem:[%s2520_s23 + $0x20] sm:$0xff] %v1642_v38   ;;  %v629_v41 = vpop.f32.mrf.mxu2  ;;  %v852_v38 = vmul.f32 %v2513_v22, %v2513_v22  ;;  %v854_v39 = vmul.f32 %v2541_v52, %v2541_v52 }
 0x136   : > { %v678_v42 = vpop.f32.mrf.mxu3  ;;  %v630_v49 = vadd.f32 %v2498_v5, %v629_v41  ;;  %v828_v41 = vadd.f32 %v2515_v23, %v2513_v22 }
 0x137   : > { %v611_v44 = vpop.f32.mrf.mxu0 }
 0x138   : > { %v660_v45 = vpop.f32.mrf.mxu1  ;;  %v612_v47 = vadd.f32 %v2498_v5, %v611_v44  ;;  %v679_v56 = vadd.f32 %v678_v42, %v630_v49  ;;  %v701_v44 = vadd.s32 56, %v2492_v4  ;;  %v829_v48 = vadd.f32 %v828_v41, %v2541_v52 }
 0x13a   : > { %v661_v50 = vadd.f32 %v660_v45, %v612_v47  ;;  %v2550_v62 = vsel %vm738_vm6, %v679_v56, 0.0  ;;  %v868_v45 = vadd.f32 %v853_v29, %v852_v38 }
 0x13b   : > { %v862_v31 = vmul.f32 %v2550_v62, %v2550_v62 }
 0x13c   : > { %v2543_v53 = vsel %vm731_vm5, %v661_v50, 0.0  ;;  %v869_v50 = vadd.f32 %v868_v45, %v854_v39 }
 0x13d   : > { %v1627_v55 = vpack.c.bf16 %v2543_v53, %v2541_v52  ;;  %v631_v57 = vpop.f32.mrf.mxu2  ;;  %v855_v46 = vmul.f32 %v2543_v53, %v2543_v53  ;;  %v830_v22 = vadd.f32 %v829_v48, %v2543_v53 }
 0x13e   : > { %v680_v58 = vpop.f32.mrf.mxu3  ;;  %v632_v60 = vadd.f32 %v2498_v5, %v631_v57 }
 0x13f   : > { %1691 = vst [vmem:[%s2520_s23 + $0x8] sm:$0xff] %v1627_v55   ;;  %v614_v59 = vpop.f32.mrf.mxu0  ;;  %v719_v55 = vadd.s32 %v2501_v7, %v701_v44  ;;  %v870_v56 = vadd.f32 %v869_v50, %v855_v46 }
 0x140   : > { %v663_v61 = vpop.f32.mrf.mxu1  ;;  %v681_v0 = vadd.f32 %v680_v58, %v632_v60  ;;  %v615_v3 = vadd.f32 %v2498_v5, %v614_v59  ;;  %v708_v60 = vadd.s32 112, %v2492_v4 }
 0x141   : > { %vm735_vm13 = vcmp.lt.s32.totalorder %v719_v55, 200 }
 0x142   : > { %v2554_v2 = vsel %vm739_vm7, %v681_v0, 0.0  ;;  %v664_v15 = vadd.f32 %v663_v61, %v615_v3  ;;  %v709_v3 = vadd.s32 120, %v2492_v4 }
 0x143   : > { %v1647_v6 = vpack.c.bf16 %v2554_v2, %v2550_v62 }
 0x144   : > { %v780_v24 = vsel %vm732_vm8, %v664_v15, 0.0  ;;  %v727_v15 = vadd.s32 %v2501_v7, %v709_v3 }
 0x145   : > { %1695 = vst [vmem:[%s2520_s23 + $0x28] sm:$0xff] %v1647_v6   ;;  %v634_v10 = vpop.f32.mrf.mxu2  ;;  %v856_v51 = vmul.f32 %v780_v24, %v780_v24  ;;  %v831_v61 = vadd.f32 %v830_v22, %v780_v24 }
 0x146   : > { %v683_v11 = vpop.f32.mrf.mxu3  ;;  %v635_v18 = vadd.f32 %v2498_v5, %v634_v10  ;;  %vm743_vm15 = vcmp.lt.s32.totalorder %v727_v15, 200 }
 0x147   : > { %v616_v13 = vpop.f32.mrf.mxu0  ;;  %v871_v52 = vadd.f32 %v870_v56, %v856_v51 }
 0x148   : > { %v665_v14 = vpop.f32.mrf.mxu1  ;;  %v617_v16 = vadd.f32 %v2498_v5, %v616_v13  ;;  %v684_v28 = vadd.f32 %v683_v11, %v635_v18  ;;  %v726_v11 = vadd.s32 %v2501_v7, %v708_v60  ;;  %v861_v7 = vmul.f32 %v2528_v36, %v2528_v36 }
 0x14a   : > { %v666_v19 = vadd.f32 %v665_v14, %v617_v16  ;;  %v2581_v42 = vsel %vm740_vm10, %v684_v28, 0.0  ;;  %vm742_vm14 = vcmp.lt.s32.totalorder %v726_v11, 200 }
 0x14c   : > { %v781_v25 = vsel %vm733_vm9, %v666_v19, 0.0 }
 0x14d   : > { %v1632_v27 = vpack.c.bf16 %v781_v25, %v780_v24  ;;  %v636_v30 = vpop.f32.mrf.mxu2  ;;  %v857_v57 = vmul.f32 %v781_v25, %v781_v25  ;;  %v832_v6 = vadd.f32 %v831_v61, %v781_v25  ;;  %v851_v61 = vld [vmem:[#allocation4] sm:$0x1] }
 0x14e   : > { %v685_v33 = vpop.f32.mrf.mxu3  ;;  %v637_v35 = vadd.f32 %v2498_v5, %v636_v30 }
 0x14f   : > { %1692 = vst [vmem:[%s2520_s23 + $0x10] sm:$0xff] %v1632_v27   ;;  %v619_v34 = vpop.f32.mrf.mxu0  ;;  %v872_v9 = vadd.f32 %v871_v52, %v857_v57 }
 0x150   : > { %v668_v37 = vpop.f32.mrf.mxu1  ;;  %v620_v40 = vadd.f32 %v2498_v5, %v619_v34  ;;  %v686_v43 = vadd.f32 %v685_v33, %v637_v35 }
 0x152   : > { %v669_v47 = vadd.f32 %v668_v37, %v620_v40  ;;  %v789_v49 = vsel %vm741_vm11, %v686_v43, 0.0 }
 0x153   : > { %v1652_v54 = vpack.c.bf16 %v789_v49, %v2581_v42  ;;  %v865_v41 = vmul.f32 %v789_v49, %v789_v49 }
 0x154   : > { %v782_v23 = vsel %vm734_vm12, %v669_v47, 0.0 }
 0x155   : > { %1696 = vst [vmem:[%s2520_s23 + $0x30] sm:$0xff] %v1652_v54   ;;  %v639_v58 = vpop.f32.mrf.mxu2  ;;  %v858_v0 = vmul.f32 %v782_v23, %v782_v23  ;;  %v833_v12 = vadd.f32 %v832_v6, %v782_v23 }
 0x156   : > { %v688_v59 = vpop.f32.mrf.mxu3  ;;  %v640_v53 = vadd.f32 %v2498_v5, %v639_v58 }
 0x157   : > { %v621_v63 = vpop.f32.mrf.mxu0  ;;  %v873_v13 = vadd.f32 %v872_v9, %v858_v0 }
 0x158   : > { %v622_v1 = vadd.f32 %v2498_v5, %v621_v63  ;;  %v670_v8 = vpop.f32.mrf.mxu1  ;;  %v689_v19 = vadd.f32 %v688_v59, %v640_v53  ;;  %v827_v59 = vld [vmem:[#allocation3] sm:$0x1] }
 0x15a   : > { %v671_v10 = vadd.f32 %v670_v8, %v622_v1  ;;  %v790_v29 = vsel %vm742_vm14, %v689_v19, 0.0 }
 0x15b   : > { %v866_v45 = vmul.f32 %v790_v29, %v790_v29 }
 0x15c   : > { %v783_v14 = vsel %vm735_vm13, %v671_v10, 0.0 }
 0x15d   : > { %v1637_v16 = vpack.c.bf16 %v783_v14, %v782_v23  ;;  %v834_v17 = vadd.f32 %v833_v12, %v783_v14  ;;  %v859_v18 = vmul.f32 %v783_v14, %v783_v14  ;;  %v641_v4 = vpop.f32.mrf.mxu2 }
 0x15e   : > { %v690_v20 = vpop.f32.mrf.mxu3  ;;  %v642_v26 = vadd.f32 %v2498_v5, %v641_v4  ;;  %v863_v5 = vmul.f32 %v2554_v2, %v2554_v2 }
 0x15f   : > { %1693 = vst [vmem:[%s2520_s23 + $0x18] sm:$0xff] %v1637_v16   ;;  %v835_v24 = vadd.f32 %v834_v17, %v2524_v32  ;;  %v874_v25 = vadd.f32 %v873_v13, %v859_v18 }
 0x160   : > { %v691_v30 = vadd.f32 %v690_v20, %v642_v26 }
 0x161   : > { %v836_v27 = vadd.f32 %v835_v24, %v2528_v36  ;;  %v875_v28 = vadd.f32 %v874_v25, %v860_v21  ;;  %v864_v36 = vmul.f32 %v2581_v42, %v2581_v42 }
 0x162   : > { %v791_v32 = vsel %vm743_vm15, %v691_v30, 0.0 }
 0x163   : > { %v837_v33 = vadd.f32 %v836_v27, %v2550_v62  ;;  %v876_v34 = vadd.f32 %v875_v28, %v861_v7  ;;  %v1657_v35 = vpack.c.bf16 %v791_v32, %v790_v29  ;;  %v867_v50 = vmul.f32 %v791_v32, %v791_v32 }
 0x165   : > { %v877_v37 = vadd.f32 %v876_v34, %v862_v31  ;;  %v838_v38 = vadd.f32 %v837_v33, %v2554_v2  ;;  %1697 = vst [vmem:[%s2520_s23 + $0x38] sm:$0xff] %v1657_v35  }
 0x167   : > { %v839_v39 = vadd.f32 %v838_v38, %v2581_v42  ;;  %v878_v40 = vadd.f32 %v877_v37, %v863_v5 }
 0x169   : > { %v840_v43 = vadd.f32 %v839_v39, %v789_v49  ;;  %v879_v44 = vadd.f32 %v878_v40, %v864_v36 }
 0x16b   : > { %v841_v62 = vadd.f32 %v840_v43, %v790_v29  ;;  %v880_v46 = vadd.f32 %v879_v44, %v865_v41 }
 0x16d   : > { %v881_v47 = vadd.f32 %v880_v46, %v866_v45  ;;  %v842_v48 = vadd.f32 %v841_v62, %v791_v32 }
 0x16f   : > { %v843_v51 = vrot.slane %v842_v48, 4  ;;  %v882_v54 = vadd.f32 %v881_v47, %v867_v50 }
 0x171   : > { %v844_v22 = vadd.f32 %v843_v51, %v842_v48  ;;  %v883_v2 = vrot.slane %v882_v54, 4 }
 0x173   : > { %v845_v23 = vrot.slane %v844_v22, 2  ;;  %v884_v55 = vadd.f32 %v883_v2, %v882_v54 }
 0x175   : > { %v846_v56 = vadd.f32 %v845_v23, %v844_v22  ;;  %v885_v57 = vrot.slane %v884_v55, 2 }
 0x177   : > { %v847_v58 = vrot.slane %v846_v56, 1  ;;  %v886_v42 = vadd.f32 %v885_v57, %v884_v55 }
 0x179   : > { %v848_v60 = vadd.f32 %v847_v58, %v846_v56  ;;  %v887_v49 = vrot.slane %v886_v42, 1 }
 0x17b   : > { %v849_v63 = vadd.f32 %v848_v60, %v827_v59  ;;  %v888_v52 = vadd.f32 %v887_v49, %v886_v42 }
 0x17d   : > { %850 = vst [vmem:[#allocation3] sm:$0x1] %v849_v63  ;;  %v889_v0 = vadd.f32 %v888_v52, %v851_v61 }
 0x17f   : > { %890 = vst [vmem:[#allocation4] sm:$0x1] %v889_v0 }
 0x180 PF: > { %s2846_s7 = sld [smem:[#allocation23_spill]] }
 0x186   : > { %p1500_p6 = scmp.ne.s32.totalorder %s2846_s7, 1 }
 0x187   : > { %s2847_s18 = sld [smem:[#allocation22_spill]] (!%p1500_p6) }
 0x188   : > { %894 = sbr.rel (%p1500_p6) target bundleno = 668 (0x29c), region = 80 }
 0x18d   : > { %p1501_p5 = scmp.ne.s32.totalorder %s2847_s18, 0 }
 0x18f   : > { %898 = sbr.rel (%p1501_p5) target bundleno = 440 (0x1b8), region = 84 }
 0x194   : > { %v899_v1 = vld [vmem:[#allocation3] sm:$0x1]  ;;  %v901_v3 = vld [vmem:[#allocation4] sm:$0x1]  ;;  %v906_v17 = vld [vmem:[#allocation12] sm:$0x1] }
 0x195   : > { %v900_v6 = vmul.f32 0.005, %v899_v1  ;;  %v902_v53 = vmul.f32 0.005, %v901_v3  ;;  %v920_v20 = vld [vmem:[#allocation13] sm:$0x1] }
 0x197   : > { %v903_v8 = vmul.f32 %v900_v6, %v900_v6 }
 0x199   : > { %v904_v9 = vsub.f32 %v902_v53, %v903_v8 }
 0x19b   : > { %v905_v10 = vmax.f32 %v904_v9, 0.0 }
 0x19d   : > { %v907_v11 = vadd.f32 1e-05, %v905_v10 }
 0x19f   : > { %1883 = vrsqrt.f32 %v907_v11  ;;  %vm914_vm0 = vweird.f32 %v907_v11 }
 0x1a5   : > { %v1884_v12 = vpop.eup %1883 }
 0x1a6   : > { %v909_v13 = vmul.f32 %v1884_v12, %v907_v11  ;;  %vm915_vm1 = vweird.f32 %v1884_v12 }
 0x1a7   : > { %vm916_vm2 = vmor %vm914_vm0, %vm915_vm1 }
 0x1a8   : > { %v910_v14 = vmul.f32 %v1884_v12, %v909_v13 }
 0x1aa   : > { %v911_v15 = vmul.f32 0.5, %v910_v14 }
 0x1ac   : > { %v912_v16 = vsub.f32 1.5, %v911_v15 }
 0x1ae   : > { %v913_v18 = vmul.f32 %v1884_v12, %v912_v16 }
 0x1b0   : > { %v917_v19 = vsel %vm916_vm2, %v1884_v12, %v913_v18 }
 0x1b1   : > { %v918_v4 = vmul.f32 %v917_v19, %v906_v17 }
 0x1b3   : > { %919 = vst [vmem:[#allocation5] sm:$0x1] %v918_v4  ;;  %v921_v21 = vmul.f32 %v918_v4, %v900_v6 }
 0x1b5   : > { %v922_v24 = vsub.f32 %v920_v20, %v921_v21 }
 0x1b7   : > { %923 = vst [vmem:[#allocation6] sm:$0x1] %v922_v24 }
 0x1b8 PF: > { %v1562_v25 = vld [vmem:[#allocation15 + $0x70] sm:$0xf]  ;;  %v1615_v26 = vld [vmem:[#allocation15 + $0x74] sm:$0xf0]  ;;  %v1614_v7 = vld [vmem:[#allocation15 + $0x74] sm:$0xf] }
 0x1b9   : > { %v1563_v27 = vor.u32 %v1615_v26, %v1562_v25  ;;  %v1564_v28 = vld [vmem:[#allocation15 + $0x78] sm:$0xf0]  ;;  %v1554_v29 = vld [vmem:[#allocation15 + $0x60] sm:$0xf]  ;;  %v1613_v30 = vld [vmem:[#allocation15 + $0x64] sm:$0xf0] }
 0x1ba   : > { %v1567_v31 = vor.u32 %v1614_v7, %v1564_v28  ;;  %v1612_v33 = vld [vmem:[#allocation15 + $0x64] sm:$0xf]  ;;  %v1556_v34 = vld [vmem:[#allocation15 + $0x68] sm:$0xf0]  ;;  %v1555_v32 = vor.u32 %v1613_v30, %v1554_v29  ;;  %s2848_s27 = sld [smem:[#allocation22_spill]] }
 0x1bb   : > { %1125 = vmatpush.bf16.msra.mxu0 %v1563_v27  ;;  %1721 = vmatpush.bf16.msra.mxu2 %v1563_v27  ;;  %v1559_v35 = vor.u32 %v1612_v33, %v1556_v34  ;;  %v1546_v5 = vld [vmem:[#allocation15 + $0x50] sm:$0xf]  ;;  %v1611_v37 = vld [vmem:[#allocation15 + $0x54] sm:$0xf0]  ;;  %v1610_v38 = vld [vmem:[#allocation15 + $0x54] sm:$0xf] }
 0x1bc   : > { %1174 = vmatpush.bf16.msra.mxu1 %v1567_v31  ;;  %1729 = vmatpush.bf16.msra.mxu3 %v1567_v31  ;;  %v1548_v36 = vld [vmem:[#allocation15 + $0x58] sm:$0xf0]  ;;  %v1547_v39 = vor.u32 %v1611_v37, %v1546_v5  ;;  %v1538_v41 = vld [vmem:[#allocation15 + $0x40] sm:$0xf]  ;;  %v1609_v43 = vld [vmem:[#allocation15 + $0x44] sm:$0xf0] }
 0x1bd   : > { %v1551_v40 = vor.u32 %v1610_v38, %v1548_v36  ;;  %v1608_v44 = vld [vmem:[#allocation15 + $0x44] sm:$0xf]  ;;  %v1540_v62 = vld [vmem:[#allocation15 + $0x48] sm:$0xf0]  ;;  %v1539_v45 = vor.u32 %v1609_v43, %v1538_v41  ;;  %v1530_v46 = vld [vmem:[#allocation15 + $0x30] sm:$0xf] }
 0x1be   : > { %v1543_v47 = vor.u32 %v1608_v44, %v1540_v62  ;;  %v1607_v48 = vld [vmem:[#allocation15 + $0x34] sm:$0xf0]  ;;  %v1606_v51 = vld [vmem:[#allocation15 + $0x34] sm:$0xf]  ;;  %v1532_v54 = vld [vmem:[#allocation15 + $0x38] sm:$0xf0] }
 0x1bf   : > { %1126 = vmatpush.bf16.msra.mxu0 %v1555_v32  ;;  %1722 = vmatpush.bf16.msra.mxu2 %v1555_v32  ;;  %v2622_v55 = vld [vmem:[#allocation5] ss:$0 sm:$0xff]  ;;  %v1531_v58 = vor.u32 %v1607_v48, %v1530_v46  ;;  %v1535_v42 = vor.u32 %v1606_v51, %v1532_v54  ;;  %v1522_v59 = vld [vmem:[#allocation15 + $0x20] sm:$0xf]  ;;  %v1605_v60 = vld [vmem:[#allocation15 + $0x24] sm:$0xf0] }
 0x1c0   : > { %1175 = vmatpush.bf16.msra.mxu1 %v1559_v35  ;;  %1730 = vmatpush.bf16.msra.mxu3 %v1559_v35  ;;  %s1599_s16 = sshll.u32 %s2848_s27, 6  ;;  %v1604_v49 = vld [vmem:[#allocation15 + $0x24] sm:$0xf]  ;;  %v1524_v61 = vld [vmem:[#allocation15 + $0x28] sm:$0xf0]  ;;  %v1523_v6 = vor.u32 %v1605_v60, %v1522_v59  ;;  %s2849_s4 = sld [smem:[#allocation33_spill]] }
 0x1c1   : > { %s2618_s14 = scalar_lea.vmem [#allocation2], %s1599_s16  ;;  %v2626_v0 = vld [vmem:[#allocation6] ss:$0 sm:$0xff]  ;;  %v1527_v53 = vor.u32 %v1604_v49, %v1524_v61  ;;  %v1514_v8 = vld [vmem:[#allocation15 + $0x10] sm:$0xf] }
 0x1c2   : > { %v1660_v50 = vld [vmem:[%s2618_s14] sm:$0xff]   ;;  %v1602_v10 = vld [vmem:[#allocation15 + $0x14] sm:$0xf]  ;;  %v1506_v18 = vld [vmem:[#allocation15] sm:$0xf] }
 0x1c3   : > { %1127 = vmatpush.bf16.msra.mxu0 %v1547_v39  ;;  %1723 = vmatpush.bf16.msra.mxu2 %v1547_v39  ;;  %v1701_v22 = vld [vmem:[%s2618_s14 + $0x20] sm:$0xff]   ;;  %v1661_v2 = vunpack.c.l.bf16 %v1660_v50  ;;  %v1662_v23 = vunpack.c.h.bf16 %v1660_v50  ;;  %v1601_v19 = vld [vmem:[#allocation15 + $0x4] sm:$0xf0]  ;;  %v1600_v4 = vld [vmem:[#allocation15 + $0x4] sm:$0xf] }
 0x1c4   : > { %1176 = vmatpush.bf16.msra.mxu1 %v1551_v40  ;;  %1731 = vmatpush.bf16.msra.mxu3 %v1551_v40  ;;  %v1677_v56 = vunpack.c.l.bf16 %v1701_v22  ;;  %v1678_v57 = vunpack.c.h.bf16 %v1701_v22  ;;  %v1603_v9 = vld [vmem:[#allocation15 + $0x14] sm:$0xf0]  ;;  %v1516_v11 = vld [vmem:[#allocation15 + $0x18] sm:$0xf0]  ;;  %v1508_v20 = vld [vmem:[#allocation15 + $0x8] sm:$0xf0]  ;;  %v1507_v27 = vor.u32 %v1601_v19, %v1506_v18 }
 0x1c5   : > { %v963_v63 = vmul.f32 %v2622_v55, %v1661_v2  ;;  %v964_v52 = vmul.f32 %v2622_v55, %v1662_v23  ;;  %v1515_v16 = vor.u32 %v1603_v9, %v1514_v8  ;;  %v1519_v17 = vor.u32 %v1602_v10, %v1516_v11  ;;  %v1698_v7 = vld [vmem:[%s2618_s14 + $0x8] sm:$0xff]   ;;  %v1703_v48 = vld [vmem:[%s2618_s14 + $0x30] sm:$0xff]  }
 0x1c6   : > { %v971_v1 = vmul.f32 %v2622_v55, %v1677_v56  ;;  %v972_v3 = vmul.f32 %v2622_v55, %v1678_v57  ;;  %v1702_v28 = vld [vmem:[%s2618_s14 + $0x28] sm:$0xff]   ;;  %v1511_v29 = vor.u32 %v1600_v4, %v1508_v20  ;;  %v1665_v30 = vunpack.c.l.bf16 %v1698_v7 }
 0x1c7   : > { %1128 = vmatpush.bf16.msra.mxu0 %v1539_v45  ;;  %1724 = vmatpush.bf16.msra.mxu2 %v1539_v45  ;;  %v983_v12 = vadd.f32 %v2626_v0, %v963_v63  ;;  %v984_v13 = vadd.f32 %v2626_v0, %v964_v52  ;;  %v1666_v31 = vunpack.c.h.bf16 %v1698_v7  ;;  %v1681_v32 = vunpack.c.l.bf16 %v1702_v28 }
 0x1c8   : > { %1177 = vmatpush.bf16.msra.mxu1 %v1543_v47  ;;  %1732 = vmatpush.bf16.msra.mxu3 %v1543_v47  ;;  %v991_v14 = vadd.f32 %v2626_v0, %v971_v1  ;;  %v992_v15 = vadd.f32 %v2626_v0, %v972_v3  ;;  %v1682_v35 = vunpack.c.h.bf16 %v1702_v28  ;;  %v965_v5 = vmul.f32 %v2622_v55, %v1665_v30  ;;  %v1699_v47 = vld [vmem:[%s2618_s14 + $0x10] sm:$0xff]  }
 0x1c9   : > { %v999_v21 = vmax.f32 %v983_v12, 0.0  ;;  %v1000_v24 = vmax.f32 %v984_v13, 0.0  ;;  %v966_v37 = vmul.f32 %v2622_v55, %v1666_v31  ;;  %v973_v38 = vmul.f32 %v2622_v55, %v1681_v32 }
 0x1ca   : > { %v1007_v25 = vmax.f32 %v991_v14, 0.0  ;;  %v1008_v26 = vmax.f32 %v992_v15, 0.0  ;;  %v974_v36 = vmul.f32 %v2622_v55, %v1682_v35  ;;  %v985_v39 = vadd.f32 %v2626_v0, %v965_v5 }
 0x1cb   : > { %1129 = vmatpush.bf16.msra.mxu0 %v1531_v58  ;;  %1725 = vmatpush.bf16.msra.mxu2 %v1531_v58  ;;  %v1015_v33 = vpack.c.bf16 %v1000_v24, %v999_v21  ;;  %v986_v40 = vadd.f32 %v2626_v0, %v966_v37  ;;  %v993_v41 = vadd.f32 %v2626_v0, %v973_v38  ;;  %v1669_v50 = vunpack.c.l.bf16 %v1699_v47 }
 0x1cc   : > { %1178 = vmatpush.bf16.msra.mxu1 %v1535_v42  ;;  %1733 = vmatpush.bf16.msra.mxu3 %v1535_v42  ;;  %v1019_v34 = vpack.c.bf16 %v1008_v26, %v1007_v25  ;;  %v994_v43 = vadd.f32 %v2626_v0, %v974_v36  ;;  %v1001_v44 = vmax.f32 %v985_v39, 0.0  ;;  %v1670_v51 = vunpack.c.h.bf16 %v1699_v47 }
 0x1cd   : > { %v1002_v62 = vmax.f32 %v986_v40, 0.0  ;;  %v1009_v45 = vmax.f32 %v993_v41, 0.0  ;;  %v1685_v2 = vunpack.c.l.bf16 %v1703_v48  ;;  %v1686_v23 = vunpack.c.h.bf16 %v1703_v48 }
 0x1ce   : > { %v1010_v46 = vmax.f32 %v994_v43, 0.0  ;;  %v967_v56 = vmul.f32 %v2622_v55, %v1669_v50  ;;  %v968_v57 = vmul.f32 %v2622_v55, %v1670_v51 }
 0x1cf   : > { %1130 = vmatpush.bf16.msra.mxu0 %v1523_v6  ;;  %1726 = vmatpush.bf16.msra.mxu2 %v1523_v6  ;;  %v1016_v54 = vpack.c.bf16 %v1002_v62, %v1001_v44  ;;  %v975_v58 = vmul.f32 %v2622_v55, %v1685_v2  ;;  %v976_v42 = vmul.f32 %v2622_v55, %v1686_v23  ;;  %v1700_v6 = vld [vmem:[%s2618_s14 + $0x18] sm:$0xff]  }
 0x1d0   : > { %1179 = vmatpush.bf16.msra.mxu1 %v1527_v53  ;;  %1734 = vmatpush.bf16.msra.mxu3 %v1527_v53  ;;  %v1020_v22 = vpack.c.bf16 %v1010_v46, %v1009_v45  ;;  %v987_v59 = vadd.f32 %v2626_v0, %v967_v56  ;;  %v988_v60 = vadd.f32 %v2626_v0, %v968_v57  ;;  %v1704_v53 = vld [vmem:[%s2618_s14 + $0x38] sm:$0xff]   ;;  %v1673_v9 = vunpack.c.l.bf16 %v1700_v6 }
 0x1d1   : > { %v995_v49 = vadd.f32 %v2626_v0, %v975_v58  ;;  %v996_v61 = vadd.f32 %v2626_v0, %v976_v42  ;;  %v1674_v11 = vunpack.c.h.bf16 %v1700_v6  ;;  %v1689_v12 = vunpack.c.l.bf16 %v1704_v53 }
 0x1d2   : > { %v1003_v63 = vmax.f32 %v987_v59, 0.0  ;;  %v1004_v52 = vmax.f32 %v988_v60, 0.0  ;;  %v1690_v13 = vunpack.c.h.bf16 %v1704_v53  ;;  %v969_v14 = vmul.f32 %v2622_v55, %v1673_v9 }
 0x1d3   : > { %1131 = vmatpush.bf16.msra.mxu0 %v1515_v16  ;;  %1727 = vmatpush.bf16.msra.mxu2 %v1515_v16  ;;  %v1011_v1 = vmax.f32 %v995_v49, 0.0  ;;  %v1012_v3 = vmax.f32 %v996_v61, 0.0  ;;  %v970_v15 = vmul.f32 %v2622_v55, %v1674_v11  ;;  %v977_v16 = vmul.f32 %v2622_v55, %v1689_v12 }
 0x1d4   : > { %1180 = vmatpush.bf16.msra.mxu1 %v1519_v17  ;;  %1735 = vmatpush.bf16.msra.mxu3 %v1519_v17  ;;  %v1017_v8 = vpack.c.bf16 %v1004_v52, %v1003_v63  ;;  %v978_v17 = vmul.f32 %v2622_v55, %v1690_v13  ;;  %v989_v18 = vadd.f32 %v2626_v0, %v969_v14  ;;  %v1039_v55 = vld [vmem:[%s2849_s4] sm:$0x3] }
 0x1d5   : > { %v1021_v10 = vpack.c.bf16 %v1012_v3, %v1011_v1  ;;  %v990_v19 = vadd.f32 %v2626_v0, %v970_v15  ;;  %v997_v4 = vadd.f32 %v2626_v0, %v977_v16  ;;  %v2667_v28 = vperm.slane %v1039_v55, 0 }
 0x1d6   : > { %v998_v20 = vadd.f32 %v2626_v0, %v978_v17  ;;  %v1005_v21 = vmax.f32 %v989_v18, 0.0 }
 0x1d7   : > { %1132 = vmatpush.bf16.msra.mxu0 %v1507_v27  ;;  %1728 = vmatpush.bf16.msra.mxu2 %v1507_v27  ;;  %v1006_v24 = vmax.f32 %v990_v19, 0.0  ;;  %v1013_v25 = vmax.f32 %v997_v4, 0.0 }
 0x1d8   : > { %1181 = vmatpush.bf16.msra.mxu1 %v1511_v29  ;;  %1736 = vmatpush.bf16.msra.mxu3 %v1511_v29  ;;  %v1014_v26 = vmax.f32 %v998_v20, 0.0  ;;  %v2669_v29 = vperm.slane %v1039_v55, 1 }
 0x1d9   : > { %v1018_v7 = vpack.c.bf16 %v1006_v24, %v1005_v21 }
 0x1da   : > { %1133 = vmatmul.bf16.vlgmr.msra.gmra.mxu0 %v1015_v33  ;;  %1153 = vmatmul.bf16.vlgmr.msra.gmra.mxu2 %v1019_v34  ;;  %v1022_v27 = vpack.c.bf16 %v1014_v26, %v1013_v25 }
 0x1db   : > { %1182 = vmatmul.bf16.vlgmr.msra.gmra.mxu1 %v1015_v33  ;;  %1202 = vmatmul.bf16.vlgmr.msra.gmra.mxu3 %v1019_v34 }
 0x1ea   : > { %1138 = vmatmul.bf16.gmra.mxu0 %v1016_v54  ;;  %1158 = vmatmul.bf16.gmra.mxu2 %v1020_v22 }
 0x1eb   : > { %1187 = vmatmul.bf16.gmra.mxu1 %v1016_v54  ;;  %1207 = vmatmul.bf16.gmra.mxu3 %v1020_v22 }
 0x1fa   : > { %1143 = vmatmul.bf16.gmra.mxu0 %v1017_v8  ;;  %1163 = vmatmul.bf16.gmra.mxu2 %v1021_v10 }
 0x1fb   : > { %1192 = vmatmul.bf16.gmra.mxu1 %v1017_v8  ;;  %1212 = vmatmul.bf16.gmra.mxu3 %v1021_v10 }
 0x20a   : > { %1148 = vmatmul.bf16.gmra.mxu0 %v1018_v7  ;;  %1168 = vmatmul.bf16.gmra.mxu2 %v1022_v27 }
 0x20b   : > { %1197 = vmatmul.bf16.gmra.mxu1 %v1018_v7  ;;  %1217 = vmatmul.bf16.gmra.mxu3 %v1022_v27 }
 0x257   : > { %v1134_v0 = vpop.f32.mrf.mxu0 }
 0x258   : > { %v1135_v30 = vadd.f32 %v1134_v0, %v2667_v28  ;;  %v1183_v31 = vpop.f32.mrf.mxu1 }
 0x259   : > { %v1184_v33 = vadd.f32 %v1183_v31, %v2669_v29 }
 0x25b   : > { %v1223_v34 = vpack.c.bf16 %v1184_v33, %v1135_v30 }
 0x25d   : > { %1239 = vst [vmem:[%s2456_s26] sm:$0xff] %v1223_v34  ;;  %v1154_v32 = vpop.f32.mrf.mxu2 }
 0x25e   : > { %v1155_v35 = vadd.f32 %v1154_v32, %v2667_v28  ;;  %v1203_v5 = vpop.f32.mrf.mxu3 }
 0x25f   : > { %v1204_v37 = vadd.f32 %v1203_v5, %v2669_v29  ;;  %v1136_v38 = vpop.f32.mrf.mxu0 }
 0x260   : > { %v1137_v36 = vadd.f32 %v1136_v38, %v2667_v28  ;;  %v1185_v39 = vpop.f32.mrf.mxu1 }
 0x261   : > { %v1231_v40 = vpack.c.bf16 %v1204_v37, %v1155_v35  ;;  %v1186_v41 = vadd.f32 %v1185_v39, %v2669_v29 }
 0x263   : > { %1247 = vst [vmem:[%s2456_s26 + $0x40] sm:$0xff] %v1231_v40  ;;  %v1224_v43 = vpack.c.bf16 %v1186_v41, %v1137_v36 }
 0x265   : > { %1240 = vst [vmem:[%s2456_s26 + $0x8] sm:$0xff] %v1224_v43  ;;  %v1156_v44 = vpop.f32.mrf.mxu2 }
 0x266   : > { %v1157_v62 = vadd.f32 %v1156_v44, %v2667_v28  ;;  %v1205_v45 = vpop.f32.mrf.mxu3 }
 0x267   : > { %v1206_v46 = vadd.f32 %v1205_v45, %v2669_v29  ;;  %v1139_v47 = vpop.f32.mrf.mxu0 }
 0x268   : > { %v1140_v48 = vadd.f32 %v1139_v47, %v2667_v28  ;;  %v1188_v50 = vpop.f32.mrf.mxu1 }
 0x269   : > { %v1232_v51 = vpack.c.bf16 %v1206_v46, %v1157_v62  ;;  %v1189_v54 = vadd.f32 %v1188_v50, %v2669_v29 }
 0x26b   : > { %1248 = vst [vmem:[%s2456_s26 + $0x48] sm:$0xff] %v1232_v51  ;;  %v1225_v22 = vpack.c.bf16 %v1189_v54, %v1140_v48 }
 0x26d   : > { %1241 = vst [vmem:[%s2456_s26 + $0x10] sm:$0xff] %v1225_v22  ;;  %v1159_v2 = vpop.f32.mrf.mxu2 }
 0x26e   : > { %v1160_v23 = vadd.f32 %v1159_v2, %v2667_v28  ;;  %v1208_v56 = vpop.f32.mrf.mxu3 }
 0x26f   : > { %v1209_v57 = vadd.f32 %v1208_v56, %v2669_v29  ;;  %v1141_v58 = vpop.f32.mrf.mxu0 }
 0x270   : > { %v1142_v42 = vadd.f32 %v1141_v58, %v2667_v28  ;;  %v1190_v59 = vpop.f32.mrf.mxu1 }
 0x271   : > { %v1233_v60 = vpack.c.bf16 %v1209_v57, %v1160_v23  ;;  %v1191_v49 = vadd.f32 %v1190_v59, %v2669_v29 }
 0x273   : > { %1249 = vst [vmem:[%s2456_s26 + $0x50] sm:$0xff] %v1233_v60  ;;  %v1226_v61 = vpack.c.bf16 %v1191_v49, %v1142_v42 }
 0x275   : > { %1242 = vst [vmem:[%s2456_s26 + $0x18] sm:$0xff] %v1226_v61  ;;  %v1161_v63 = vpop.f32.mrf.mxu2 }
 0x276   : > { %v1162_v52 = vadd.f32 %v1161_v63, %v2667_v28  ;;  %v1210_v1 = vpop.f32.mrf.mxu3 }
 0x277   : > { %v1211_v3 = vadd.f32 %v1210_v1, %v2669_v29  ;;  %v1144_v6 = vpop.f32.mrf.mxu0 }
 0x278   : > { %v1145_v53 = vadd.f32 %v1144_v6, %v2667_v28  ;;  %v1193_v8 = vpop.f32.mrf.mxu1 }
 0x279   : > { %v1234_v9 = vpack.c.bf16 %v1211_v3, %v1162_v52  ;;  %v1194_v10 = vadd.f32 %v1193_v8, %v2669_v29 }
 0x27b   : > { %1250 = vst [vmem:[%s2456_s26 + $0x58] sm:$0xff] %v1234_v9  ;;  %v1227_v11 = vpack.c.bf16 %v1194_v10, %v1145_v53 }
 0x27d   : > { %1243 = vst [vmem:[%s2456_s26 + $0x20] sm:$0xff] %v1227_v11  ;;  %v1164_v12 = vpop.f32.mrf.mxu2 }
 0x27e   : > { %v1165_v13 = vadd.f32 %v1164_v12, %v2667_v28  ;;  %v1213_v14 = vpop.f32.mrf.mxu3 }
 0x27f   : > { %v1214_v15 = vadd.f32 %v1213_v14, %v2669_v29  ;;  %v1146_v16 = vpop.f32.mrf.mxu0 }
 0x280   : > { %v1147_v17 = vadd.f32 %v1146_v16, %v2667_v28  ;;  %v1195_v18 = vpop.f32.mrf.mxu1 }
 0x281   : > { %v1235_v19 = vpack.c.bf16 %v1214_v15, %v1165_v13  ;;  %v1196_v4 = vadd.f32 %v1195_v18, %v2669_v29 }
 0x283   : > { %1251 = vst [vmem:[%s2456_s26 + $0x60] sm:$0xff] %v1235_v19  ;;  %v1228_v20 = vpack.c.bf16 %v1196_v4, %v1147_v17 }
 0x285   : > { %1244 = vst [vmem:[%s2456_s26 + $0x28] sm:$0xff] %v1228_v20  ;;  %v1166_v21 = vpop.f32.mrf.mxu2 }
 0x286   : > { %v1167_v24 = vadd.f32 %v1166_v21, %v2667_v28  ;;  %v1215_v25 = vpop.f32.mrf.mxu3 }
 0x287   : > { %v1216_v26 = vadd.f32 %v1215_v25, %v2669_v29  ;;  %v1149_v7 = vpop.f32.mrf.mxu0 }
 0x288   : > { %v1150_v27 = vadd.f32 %v1149_v7, %v2667_v28  ;;  %v1198_v55 = vpop.f32.mrf.mxu1 }
 0x289   : > { %v1236_v0 = vpack.c.bf16 %v1216_v26, %v1167_v24  ;;  %v1199_v30 = vadd.f32 %v1198_v55, %v2669_v29 }
 0x28b   : > { %1252 = vst [vmem:[%s2456_s26 + $0x68] sm:$0xff] %v1236_v0  ;;  %v1229_v31 = vpack.c.bf16 %v1199_v30, %v1150_v27 }
 0x28d   : > { %1245 = vst [vmem:[%s2456_s26 + $0x30] sm:$0xff] %v1229_v31  ;;  %v1169_v33 = vpop.f32.mrf.mxu2 }
 0x28e   : > { %v1170_v34 = vadd.f32 %v1169_v33, %v2667_v28  ;;  %v1218_v32 = vpop.f32.mrf.mxu3 }
 0x28f   : > { %v1219_v35 = vadd.f32 %v1218_v32, %v2669_v29  ;;  %v1151_v5 = vpop.f32.mrf.mxu0 }
 0x290   : > { %v1152_v37 = vadd.f32 %v1151_v5, %v2667_v28  ;;  %v1200_v38 = vpop.f32.mrf.mxu1 }
 0x291   : > { %v1237_v36 = vpack.c.bf16 %v1219_v35, %v1170_v34  ;;  %v1201_v39 = vadd.f32 %v1200_v38, %v2669_v29 }
 0x293   : > { %1253 = vst [vmem:[%s2456_s26 + $0x70] sm:$0xff] %v1237_v36  ;;  %v1230_v40 = vpack.c.bf16 %v1201_v39, %v1152_v37 }
 0x295   : > { %1246 = vst [vmem:[%s2456_s26 + $0x38] sm:$0xff] %v1230_v40  ;;  %v1171_v41 = vpop.f32.mrf.mxu2 }
 0x296   : > { %v1172_v43 = vadd.f32 %v1171_v41, %v2667_v28  ;;  %v1220_v44 = vpop.f32.mrf.mxu3 }
 0x297   : > { %v1221_v62 = vadd.f32 %v1220_v44, %v2669_v29 }
 0x299   : > { %v1238_v45 = vpack.c.bf16 %v1221_v62, %v1172_v43 }
 0x29b   : > { %1254 = vst [vmem:[%s2456_s26 + $0x78] sm:$0xff] %v1238_v45 }
 0x29c PF: > { %s2721_s17 = scalar_lea.sflag [#allocation9], %s387_s13  ;;  %1262 = sbr.rel (!%p2345_p12) target bundleno = 713 (0x2c9), region = 88 }
 0x29d   : > { %s2850_s9 = sld [smem:[#allocation23_spill]] (%p2345_p12) }
 0x29e   : > { %s2851_s21 = sld [smem:[#allocation22_spill]] (%p2345_p12) }
 0x2a4   : > { %s1263_s19 = smul.u32 %s2851_s21, %s2850_s9 }
 0x2a6   : > { %s1569_s20 = sshll.u32 %s1263_s19, 4 }
 0x2a7   : > { %s1265_s15 = ssub.s32 25, %s1569_s20 }
 0x2a8   : > { %p1266_p1 = scmp.lt.s32.totalorder %s1265_s15, 16 }
 0x2aa   : > { %s2876_s15 = smov (!%p1266_p1, %s1265_s15), 16 }
 0x2ab   : > { %s1616_s12 = sshll.u32 %s2876_s15, 3 }
 0x2ac   : > { %s1270_s10 = ssub.s32 128, %s1616_s12 }
 0x2ad   : > { %s1271_s30 = sshll.u32 %s1270_s10, 4 }
 0x2ae   : > { %1272 = vsyncadd %s2721_s17, %s1271_s30  ;;  %p2731_p2 = scmp.ne.s32.totalorder %s1616_s12, 0  ;;  %s1618_s13 = sshll.u32 %s1263_s19, 7 }
 0x2af   : > { %s2853_s7 = sld [smem:[#allocation34_spill]]  ;;  %s1278_s27 = sshll.u32 %s2456_s26, 4  ;;  %s2739_s27 = int_to_ptr.vmem [resolvable:$true] %s1278_s27 }
 0x2b0   : > { %s1576_s14 = sshll.u32 %s2876_s15, 7  ;;  %s2046_s1 = sshra.s32 %s2739_s27, 4  ;;  %s2047_s1 = int_to_ptr.vmem [resolvable:$true] %s2046_s1 }
 0x2b1   : > { %s2048_s2 = sshrl.u32 %s1576_s14, 4  ;;  %s2201_s9 = smov [#allocation16]  }
 0x2b2   : > { %s2053_s4 = scalar_lea.vmem %s2047_s1, %s2048_s2  ;;  %s2057_s21 = scalar_lea.vmem %s2201_s9, 256 }
 0x2b3   : > { %p2054_p12 = scmp.ne.s32.totalorder %s2047_s1, %s2053_s4  ;;  %p2059_p10 = scmp.lt.s32.totalorder %s2057_s21, %s2053_s4 }
 0x2b5   : > { %s1276_s18 = scalar_lea.hbm %s2853_s7, %s1618_s13  ;;  %p2055_p8 = pnand %p2054_p12, %p2731_p2 }
 0x2b6   : > { %s1280_s16 = sshll.u32 %s1276_s18, 4  ;;  %s2741_s16 = int_to_ptr.hbm [resolvable:$true] %s1280_s16 }
 0x2b7   : > { %p2056_p9 = pneg %p2055_p8 }
 0x2b9   : > { %p2061_p11 = pnand %p2059_p10, %p2056_p9 }
 0x2bb   : > { %2064 = shalt.err (!%p2061_p11)
}
 0x2bc   : > { %s2065_s26 = sshra.s32 %s2741_s16, 4  ;;  %s2076_s10 = scalar_lea.hbm %s2853_s7, 200  ;;  %s2066_s26 = int_to_ptr.hbm [resolvable:$true] %s2065_s26 }
 0x2bd   : > { %s2072_s19 = scalar_lea.hbm %s2066_s26, %s2048_s2  ;;  %p2077_p4 = scmp.lt.s32.totalorder %s2066_s26, %s2853_s7 }
 0x2be   : > { %p2073_p13 = scmp.ne.s32.totalorder %s2066_s26, %s2072_s19  ;;  %p2078_p6 = scmp.lt.s32.totalorder %s2076_s10, %s2072_s19 }
 0x2c0   : > { %p2074_p0 = pnand %p2073_p13, %p2731_p2  ;;  %p2079_p5 = por %p2078_p6, %p2077_p4 }
 0x2c2   : > { %p2075_p7 = pneg %p2074_p0 }
 0x2c4   : > { %p2080_p1 = pnand %p2079_p5, %p2075_p7 }
 0x2c6   : > { %2083 = shalt.err (!%p2080_p1)
}
 0x2c7   : > { %s2202_s6 = smov 128   ;;  %s2203_s23 = smov 8  }
 0x2c8   : > { %1286 = dma.vmem_to_hbm [thread:$0]  (%p2731_p2), %s2739_s27, %s1576_s14, %s2741_s16, %s2721_s17, %s2202_s6, %s2202_s6, %s2203_s23  }
 0x2c9 PF: > { %p1780_p12 = scmp.ge.s32.totalorder %s2187_s11, 2  ;;  %s1295_s18 = sand.u32 1, %s2147_s24  }
 0x2ca   : > { %s1296_s1 = scalar_lea.sflag [#allocation9], %s1295_s18 }
 0x2cb   : > { %p1769_p8 = pnand %p1780_p12, %p2355_p3 }
 0x2cd   : > { %p1770_p9 = pneg %p1769_p8 }
 0x2cf   : > { %2142 = dma.done.wait (%p1770_p9), %s1296_s1, 2048  }
 0x2d0   : > { %2144 = vsyncadd (%p1770_p9), %s1296_s1, 4294965248  ;;  %s25_s11 = sadd.s32 1, %s2187_s11   ;;  %s2854_s8 = sld [smem:[#allocation21_spill]] }
 0x2d1   : > { %p22_p10 = scmp.ge.s32.totalorder %s25_s11, 6   ;;  %s2855_s26 = sld [smem:[#allocation28_spill]] }
 0x2d2   : > { %s2856_s17 = sld [smem:[#allocation29_spill]]  ;;  %s2861_s24 = smov %s2151_s25 }
 0x2d3   : > { %s2857_s30 = sld [smem:[#allocation24_spill]]  ;;  %s2863_s27 = smov %s2163_s28 }
 0x2d4   : > { %s2858_s15 = sld [smem:[#allocation25_spill]]  ;;  %s2864_s28 = smov %s2167_s29 }
 0x2d5   : > { %s2859_s9 = sld [smem:[#allocation26_spill]] }
 0x2d6   : > { %s2860_s10 = sld [smem:[#allocation27_spill]]  ;;  %s2862_s25 = smov %s2854_s8 }
 0x2d7   :  { %24 = sbr.rel (!%p22_p10) target bundleno = 17 (0x11), region = 127 }
 0x2d8   : > { %s2865_s29 = smov %s2856_s17 }
 0x2da   : > { %s2866_s8 = smov %s2858_s15 }
 0x2dc   :  { %1302 = vsyncpa [#allocation8], 1 }
 0x2dd   :  { %1304 = vsyncpa [#allocation8 + $0x1], 1 }
 0x2de   :  { %1305 = vsyncpa [#allocation11], 1 }
 0x2df   :  { %1306 = vsyncpa [#allocation14], 1 }
 0x2e0   :  { %1307 = vsyncpa [#allocation9], 1 }
 0x2e1   :  { %1309 = vsyncpa [#allocation9 + $0x1], 1 }

</bundles_post_ra>
